<compile_context>
chip_gen: v5e
topology: v5e:2x2
jax: 0.10.0
libtpu: 0.0.40
codegen_flags: <defaults>
</compile_context>

<pallas_src>
import jax
import jax.numpy as jnp
import numpy as np
from jax.experimental import pallas as pl
from jax.experimental.pallas import tpu as pltpu


# (kernel_size, stride) of the three convs in the PyTorch module.
_CONV_CFG = ((8, 4), (4, 2), (3, 1))


def _round_up(x, m):
    return ((x + m - 1) // m) * m


def _spatial_sizes(H, W):
    sizes = [(H, W)]
    for k, s in _CONV_CFG:
        H = (H - k) // s + 1
        W = (W - k) // s + 1
        sizes.append((H, W))
    return sizes  # [(H,W), (OH1,OW1), (OH2,OW2), (OH3,OW3)]


def _bias_layout(OC1, OC2, OC3, HID2, A):
    """128-lane-aligned offsets of the packed bias segments."""
    o1 = 0
    o2 = o1 + _round_up(OC1, 128)
    o3 = o2 + _round_up(OC2, 128)
    oh1 = o3 + _round_up(OC3, 128)
    oh2 = oh1 + _round_up(HID2, 128)
    total = oh2 + _round_up(1 + A, 128)
    return o1, o2, o3, oh1, oh2, total


# ---------------------------------------------------------------------------
# Fused Pallas kernel (one grid step == one image):
#   conv1 -> conv2 -> conv3 -> dueling heads -> Q values
# ---------------------------------------------------------------------------
def _fused_dqn_kernel(cols1_ref, p2_ref, p3_ref, w1_ref, w2_ref, w3_ref,
                      wh1_ref, wh2_ref, bias_ref, o_ref):
    f32 = jnp.float32
    bf16 = jnp.bfloat16

    def mm(a, b):
        return jnp.dot(a, b, preferred_element_type=f32)

    # Static sizes derived from ref shapes.
    OC1 = w1_ref.shape[1]
    OC2 = w2_ref.shape[1]
    OC3 = w3_ref.shape[1]
    HID2 = wh1_ref.shape[1]            # = 2 * 256
    A = o_ref.shape[-1]
    K2 = w2_ref.shape[0] // OC1        # kh2*kw2
    K3 = w3_ref.shape[0] // OC2        # kh3*kw3
    R2p = p2_ref.shape[0] // K2        # sublane-padded conv2 output positions
    R3p = p3_ref.shape[0] // K3        # sublane-padded conv3 output positions
    pos3 = wh1_ref.shape[0] // OC3     # real conv3 output positions

    o1, o2, o3, oh1, oh2, _ = _bias_layout(OC1, OC2, OC3, HID2, A)
    b1 = bias_ref[:, o1:o1 + OC1]
    b2 = bias_ref[:, o2:o2 + OC2]
    b3 = bias_ref[:, o3:o3 + OC3]
    bh1 = bias_ref[:, oh1:oh1 + HID2]
    bh2 = bias_ref[:, oh2:oh2 + 1 + A]

    # ---- conv1: relu(cols1 @ W1 + b1) ------------------------------------
    y1 = jnp.maximum(mm(cols1_ref[...], w1_ref[...]) + b1, 0.0)        # [R1, OC1] f32

    # ---- conv2: MXU row-gather (per-image, 8-aligned row blocks), then
    #      ONE K2*OC1-wide matmul over the lane-concatenated im2col slab ----
    g2 = mm(p2_ref[...], y1.astype(bf16)).astype(bf16)                 # [K2*R2p, OC1]
    cols2 = jnp.concatenate(
        [g2[k * R2p:(k + 1) * R2p, :] for k in range(K2)], axis=1)     # [R2p, K2*OC1]
    y2 = jnp.maximum(mm(cols2, w2_ref[...]) + b2, 0.0)                 # [R2p, OC2] f32

    # ---- conv3 (same scheme, single K3*OC2-wide matmul) --------------------
    g3 = mm(p3_ref[...], y2.astype(bf16)).astype(bf16)                 # [K3*R3p, OC2]
    cols3 = jnp.concatenate(
        [g3[k * R3p:(k + 1) * R3p, :] for k in range(K3)], axis=1)     # [R3p, K3*OC2]
    y3 = jnp.maximum(mm(cols3, w3_ref[...]) + b3, 0.0)                 # [R3p, OC3] f32

    # ---- flatten valid rows to (spatial, channel) column order (head
    #      weights were pre-permuted to match).  pos3==1: use the padded
    #      block directly (row 0 is the real sample, pad rows are junk). -----
    if pos3 == 1:
        flat = y3                                                       # [R3p, OC3]
    else:
        flat = jnp.concatenate([y3[p:p + 1, :] for p in range(pos3)], axis=1)

    # ---- dueling heads: one dot per layer on merged weights ----------------
    h1 = jnp.maximum(mm(flat.astype(bf16), wh1_ref[...]) + bh1, 0.0)   # [., 2*HID]
    y = mm(h1.astype(bf16), wh2_ref[...]) + bh2                        # [., 1+A]
    v = y[:, 0:1]
    a = y[:, 1:1 + A]
    a_mean = jnp.sum(a, axis=1, keepdims=True) * (1.0 / A)             # reciprocal mul
    q = v + (a - a_mean)
    o_ref[0] = q[0:1, :]                                               # row 0 = this image


# ---------------------------------------------------------------------------
# Host-side helpers (one-time / trace-time constants)
# ---------------------------------------------------------------------------
def _im2col_nhwc(x_nhwc, k, s):
    """[B,H,W,C] -> [B*OH*OW, k*k*C], column order (kh, kw, c).  Cheap XLA:
    k*k strided slices + one concat along the channel axis."""
    B, H, W, C = x_nhwc.shape
    OH = (H - k) // s + 1
    OW = (W - k) // s + 1
    blocks = []
    for kh in range(k):
        for kw in range(k):
            blocks.append(x_nhwc[:, kh: kh + s * (OH - 1) + 1: s,
                                    kw: kw + s * (OW - 1) + 1: s, :])
    cols = jnp.concatenate(blocks, axis=-1)                 # [B, OH, OW, k*k*C]
    return cols.reshape(B * OH * OW, k * k * C)


def _gather_matrix(IH, IW, k, s, OH, OW, in_rows, out_pad):
    """Per-image constant 0/1 matrix P so that (P @ act)[k*out_pad + r_out, :]
    is the activation row feeding kernel offset k=(kh*k+kw) of output pixel
    r_out.  out_pad >= OH*OW keeps every per-offset row block 8-aligned;
    pad rows (and unused input columns) stay zero."""
    P = np.zeros((k * k * out_pad, in_rows), dtype=np.float32)
    for kh in range(k):
        for kw in range(k):
            base = (kh * k + kw) * out_pad
            for oh in range(OH):
                for ow in range(OW):
                    P[base + oh * OW + ow,
                      (s * oh + kh) * IW + (s * ow + kw)] = 1.0
    return P


def prepare_params(params, input_shape, n_actions):
    """One-time layout prep: conv weight flattening, merged/permuted head
    weights, packed biases, per-image gather matrices, bf16 casts."""
    C, H, W = input_shape
    (_, _), (OH1, OW1), (OH2, OW2), (OH3, OW3) = _spatial_sizes(H, W)
    (_, _), (k2, s2), (k3, s3) = _CONV_CFG
    OC1 = params["conv1_w"].shape[0]
    OC2 = params["conv2_w"].shape[0]
    OC3 = params["conv3_w"].shape[0]
    HID = params["v1_w"].shape[0]
    A = n_actions
    pos3 = OH3 * OW3
    conv_out = OC3 * pos3
    assert params["v1_w"].shape[1] == conv_out

    bf16 = jnp.bfloat16

    def conv_w_flat(w):      # [OC, IC, KH, KW] -> [(kh,kw,ic), OC]  (bf16)
        OC, IC, KH, KW = w.shape
        return jnp.transpose(w, (2, 3, 1, 0)).reshape(KH * KW * IC, OC).astype(bf16)

    # Kernel flatten order is (spatial, channel); PyTorch's .view() is
    # (channel, spatial).  Permute first-layer head weight columns once.
    perm = np.arange(conv_out).reshape(OC3, pos3).T.reshape(-1)
    wh1 = jnp.concatenate([params["v1_w"][:, perm].T,
                           params["a1_w"][:, perm].T], axis=1).astype(bf16)
    wh2 = jnp.zeros((2 * HID, 1 + A), jnp.float32)                     # block diagonal
    wh2 = wh2.at[:HID, 0:1].set(params["v2_w"].T)
    wh2 = wh2.at[HID:, 1:].set(params["a2_w"].T)
    wh2 = wh2.astype(bf16)

    # Packed biases (f32), 128-lane-aligned segments.
    o1, o2, o3, oh1, oh2, total = _bias_layout(OC1, OC2, OC3, 2 * HID, A)
    bias = jnp.zeros((1, total), jnp.float32)
    bias = bias.at[0, o1:o1 + OC1].set(params["conv1_b"])
    bias = bias.at[0, o2:o2 + OC2].set(params["conv2_b"])
    bias = bias.at[0, o3:o3 + OC3].set(params["conv3_b"])
    bias = bias.at[0, oh1:oh1 + HID].set(params["v1_b"])
    bias = bias.at[0, oh1 + HID:oh1 + 2 * HID].set(params["a1_b"])
    bias = bias.at[0, oh2:oh2 + 1].set(params["v2_b"])
    bias = bias.at[0, oh2 + 1:oh2 + 1 + A].set(params["a2_b"])

    # Per-image (batch-independent) 0/1 gather matrices, 8-aligned row blocks.
    R2p = _round_up(OH2 * OW2, 8)
    R3p = _round_up(OH3 * OW3, 8)
    p2 = jnp.asarray(_gather_matrix(OH1, OW1, k2, s2, OH2, OW2,
                                    OH1 * OW1, R2p)).astype(bf16)
    p3 = jnp.asarray(_gather_matrix(OH2, OW2, k3, s3, OH3, OW3,
                                    R2p, R3p)).astype(bf16)

    return {
        "w1": conv_w_flat(params["conv1_w"]),
        "w2": conv_w_flat(params["conv2_w"]),
        "w3": conv_w_flat(params["conv3_w"]),
        "wh1": wh1, "wh2": wh2, "bias": bias,
        "p2": p2, "p3": p3,
    }


def _full_spec(arr):
    zeros = (0,) * arr.ndim
    return pl.BlockSpec(arr.shape, lambda b, _z=zeros: _z)


def dual_dqn_forward(x, prep):
    B, C, H, W = x.shape
    (k1, s1) = _CONV_CFG[0]
    (OH1, OW1) = _spatial_sizes(H, W)[1]
    R1 = OH1 * OW1
    A = prep["wh2"].shape[1] - 1

    # conv1 im2col of the raw input (only XLA work outside the fused kernel).
    x_nhwc = jnp.transpose(x, (0, 2, 3, 1))
    cols1 = _im2col_nhwc(x_nhwc, k1, s1).astype(jnp.bfloat16)   # [B*R1, k1*k1*C]
    KC1 = cols1.shape[1]

    out = pl.pallas_call(
        _fused_dqn_kernel,
        out_shape=jax.ShapeDtypeStruct((B, 1, A), jnp.float32),
        grid=(B,),
        in_specs=[
            pl.BlockSpec((R1, KC1), lambda b: (b, 0)),          # per-image cols1
            _full_spec(prep["p2"]), _full_spec(prep["p3"]),
            _full_spec(prep["w1"]), _full_spec(prep["w2"]), _full_spec(prep["w3"]),
            _full_spec(prep["wh1"]), _full_spec(prep["wh2"]),
            _full_spec(prep["bias"]),
        ],
        out_specs=pl.BlockSpec((1, 1, A), lambda b: (b, 0, 0)),
        compiler_params=pltpu.CompilerParams(
            dimension_semantics=("parallel",)),
    )(cols1, prep["p2"], prep["p3"], prep["w1"], prep["w2"], prep["w3"],
      prep["wh1"], prep["wh2"], prep["bias"])
    return out.reshape(B, A)


# ---------------------------------------------------------------------------
# Pure-JAX reference (PyTorch semantics) for correctness checking
# ---------------------------------------------------------------------------
def dual_dqn_reference(x, params):
    hi = jax.lax.Precision.HIGHEST

    def conv(h, w, b, s):
        o = jax.lax.conv_general_dilated(
            h, w, (s, s), "VALID",
            dimension_numbers=("NCHW", "OIHW", "NCHW"), precision=hi)
        return jax.nn.relu(o + b.reshape(1, -1, 1, 1))

    h = conv(x, params["conv1_w"], params["conv1_b"], 4)
    h = conv(h, params["conv2_w"], params["conv2_b"], 2)
    h = conv(h, params["conv3_w"], params["conv3_b"], 1)
    flat = h.reshape(h.shape[0], -1)
    hv = jax.nn.relu(jnp.dot(flat, params["v1_w"].T, precision=hi) + params["v1_b"])
    v = jnp.dot(hv, params["v2_w"].T, precision=hi) + params["v2_b"]
    ha = jax.nn.relu(jnp.dot(flat, params["a1_w"].T, precision=hi) + params["a1_b"])
    a = jnp.dot(ha, params["a2_w"].T, precision=hi) + params["a2_b"]
    return v + (a - jnp.mean(a, axis=1, keepdims=True))


# ---------------------------------------------------------------------------
# Deterministic parameter init (PyTorch-like uniform(-1/sqrt(fan_in), ...))
# ---------------------------------------------------------------------------
def init_params(key, input_shape, n_actions):
    C, H, W = input_shape
    _, _, _, (OH3, OW3) = _spatial_sizes(H, W)
    conv_out = 64 * OH3 * OW3

    def uniform(k, shape, fan_in):
        bound = 1.0 / float(np.sqrt(fan_in))
        return jax.random.uniform(k, shape, jnp.float32, -bound, bound)

    keys = jax.random.split(key, 14)
    return {
        "conv1_w": uniform(keys[0], (32, C, 8, 8), C * 8 * 8),
        "conv1_b": uniform(keys[1], (32,), C * 8 * 8),
        "conv2_w": uniform(keys[2], (64, 32, 4, 4), 32 * 4 * 4),
        "conv2_b": uniform(keys[3], (64,), 32 * 4 * 4),
        "conv3_w": uniform(keys[4], (64, 64, 3, 3), 64 * 3 * 3),
        "conv3_b": uniform(keys[5], (64,), 64 * 3 * 3),
        "v1_w": uniform(keys[6], (256, conv_out), conv_out),
        "v1_b": uniform(keys[7], (256,), conv_out),
        "v2_w": uniform(keys[8], (1, 256), 256),
        "v2_b": uniform(keys[9], (1,), 256),
        "a1_w": uniform(keys[10], (256, conv_out), conv_out),
        "a1_b": uniform(keys[11], (256,), conv_out),
        "a2_w": uniform(keys[12], (n_actions, 256), 256),
        "a2_b": uniform(keys[13], (n_actions,), 256),
    }


if __name__ == "__main__":
    # Smallest spatial size compatible with the conv stack: 36 -> 8 -> 3 -> 1.
    B, C, H, W = 2, 4, 36, 36
    n_actions = 6
    input_shape = (C, H, W)

    key = jax.random.PRNGKey(0)
    k_param, k_x = jax.random.split(key)
    params = init_params(k_param, input_shape, n_actions)
    x = jax.random.normal(k_x, (B, C, H, W), jnp.float32)

    prep = prepare_params(params, input_shape, n_actions)

    fwd = jax.jit(dual_dqn_forward)
    q = jax.block_until_ready(fwd(x, prep))

    assert q.shape == (B, n_actions)
    assert bool(jnp.all(jnp.isfinite(q)))

    # Cross-check against a pure-JAX (f32, HIGHEST precision) reference of the
    # PyTorch module; bf16 MXU operands stay well within this tolerance.
    q_ref = dual_dqn_reference(x, params)
    np.testing.assert_allclose(np.asarray(q), np.asarray(q_ref), rtol=2e-2, atol=2e-2)

    print("KERNEL_OK")
</pallas_src>

<mosaic_0001>
module attributes {stable_mosaic.version = 11 : i64} {
  func.func @_fused_dqn_kernel(%arg0: i32, %arg1: memref<64x256xbf16, #tpu.memory_space<vmem>>, %arg2: memref<256x64xbf16, #tpu.memory_space<vmem>>, %arg3: memref<72x16xbf16, #tpu.memory_space<vmem>>, %arg4: memref<256x32xbf16, #tpu.memory_space<vmem>>, %arg5: memref<512x64xbf16, #tpu.memory_space<vmem>>, %arg6: memref<576x64xbf16, #tpu.memory_space<vmem>>, %arg7: memref<64x512xbf16, #tpu.memory_space<vmem>>, %arg8: memref<512x7xbf16, #tpu.memory_space<vmem>>, %arg9: memref<1x1024xf32, #tpu.memory_space<vmem>>, %arg10: memref<1x1x6xf32, #tpu.memory_space<vmem>>) attributes {dimension_semantics = [#tpu.dimension_semantics<parallel>], iteration_bounds = array<i64: 2>, scalar_prefetch = 0 : i64, scratch_operands = 0 : i64, tpu.core_type = #tpu.core_type<tc>, window_params = [{transform_indices = @transform_0, window_bounds = array<i64: 64, 256>}, {pipeline_mode = #tpu.pipeline_mode<synchronous>, transform_indices = @transform_1, window_bounds = array<i64: 256, 64>}, {pipeline_mode = #tpu.pipeline_mode<synchronous>, transform_indices = @transform_2, window_bounds = array<i64: 72, 16>}, {pipeline_mode = #tpu.pipeline_mode<synchronous>, transform_indices = @transform_3, window_bounds = array<i64: 256, 32>}, {pipeline_mode = #tpu.pipeline_mode<synchronous>, transform_indices = @transform_4, window_bounds = array<i64: 512, 64>}, {pipeline_mode = #tpu.pipeline_mode<synchronous>, transform_indices = @transform_5, window_bounds = array<i64: 576, 64>}, {pipeline_mode = #tpu.pipeline_mode<synchronous>, transform_indices = @transform_6, window_bounds = array<i64: 64, 512>}, {pipeline_mode = #tpu.pipeline_mode<synchronous>, transform_indices = @transform_7, window_bounds = array<i64: 512, 7>}, {pipeline_mode = #tpu.pipeline_mode<synchronous>, transform_indices = @transform_8, window_bounds = array<i64: 1, 1024>}, {transform_indices = @transform_9, window_bounds = array<i64: 1, 1, 6>}]} {
    %c0 = arith.constant 0 : index
    %c0_0 = arith.constant 0 : index
    %0 = vector.load %arg9[%c0, %c0_0] : memref<1x1024xf32, #tpu.memory_space<vmem>>, vector<1x32xf32>
    %c0_1 = arith.constant 0 : index
    %c128 = arith.constant 128 : index
    %1 = vector.load %arg9[%c0_1, %c128] : memref<1x1024xf32, #tpu.memory_space<vmem>>, vector<1x64xf32>
    %c0_2 = arith.constant 0 : index
    %c256 = arith.constant 256 : index
    %2 = vector.load %arg9[%c0_2, %c256] : memref<1x1024xf32, #tpu.memory_space<vmem>>, vector<1x64xf32>
    %c0_3 = arith.constant 0 : index
    %c384 = arith.constant 384 : index
    %3 = vector.load %arg9[%c0_3, %c384] : memref<1x1024xf32, #tpu.memory_space<vmem>>, vector<1x512xf32>
    %c0_4 = arith.constant 0 : index
    %c896 = arith.constant 896 : index
    %4 = vector.load %arg9[%c0_4, %c896] : memref<1x1024xf32, #tpu.memory_space<vmem>>, vector<1x7xf32>
    %c0_5 = arith.constant 0 : index
    %c0_6 = arith.constant 0 : index
    %5 = vector.load %arg1[%c0_5, %c0_6] : memref<64x256xbf16, #tpu.memory_space<vmem>>, vector<64x256xbf16>
    %c0_7 = arith.constant 0 : index
    %c0_8 = arith.constant 0 : index
    %6 = vector.load %arg4[%c0_7, %c0_8] : memref<256x32xbf16, #tpu.memory_space<vmem>>, vector<256x32xbf16>
    %cst = arith.constant dense<0.000000e+00> : vector<64x32xf32>
    %7 = tpu.matmul %5, %6, %cst {dimension_numbers = #tpu.dot_dimension_numbers<[1], [0], [0], [1], [0, 0, 1, 1], [], []>} : vector<64x256xbf16>, vector<256x32xbf16>, vector<64x32xf32> -> vector<64x32xf32>
    %8 = vector.broadcast %0 : vector<1x32xf32> to vector<64x32xf32>
    %9 = arith.addf %7, %8 : vector<64x32xf32>
    %cst_9 = arith.constant 0.000000e+00 : f32
    %10 = vector.broadcast %cst_9 : f32 to vector<64x32xf32>
    %11 = arith.maximumf %9, %10 : vector<64x32xf32>
    %c0_10 = arith.constant 0 : index
    %c0_11 = arith.constant 0 : index
    %12 = vector.load %arg2[%c0_10, %c0_11] : memref<256x64xbf16, #tpu.memory_space<vmem>>, vector<256x64xbf16>
    %13 = arith.truncf %11 : vector<64x32xf32> to vector<64x32xbf16>
    %cst_12 = arith.constant dense<0.000000e+00> : vector<256x32xf32>
    %14 = tpu.matmul %12, %13, %cst_12 {dimension_numbers = #tpu.dot_dimension_numbers<[1], [0], [0], [1], [0, 0, 1, 1], [], []>} : vector<256x64xbf16>, vector<64x32xbf16>, vector<256x32xf32> -> vector<256x32xf32>
    %15 = arith.truncf %14 : vector<256x32xf32> to vector<256x32xbf16>
    %16 = vector.extract_strided_slice %15 {offsets = [0, 0], sizes = [16, 32], strides = [1, 1]} : vector<256x32xbf16> to vector<16x32xbf16>
    %17 = vector.extract_strided_slice %15 {offsets = [16, 0], sizes = [16, 32], strides = [1, 1]} : vector<256x32xbf16> to vector<16x32xbf16>
    %18 = vector.extract_strided_slice %15 {offsets = [32, 0], sizes = [16, 32], strides = [1, 1]} : vector<256x32xbf16> to vector<16x32xbf16>
    %19 = vector.extract_strided_slice %15 {offsets = [48, 0], sizes = [16, 32], strides = [1, 1]} : vector<256x32xbf16> to vector<16x32xbf16>
    %20 = vector.extract_strided_slice %15 {offsets = [64, 0], sizes = [16, 32], strides = [1, 1]} : vector<256x32xbf16> to vector<16x32xbf16>
    %21 = vector.extract_strided_slice %15 {offsets = [80, 0], sizes = [16, 32], strides = [1, 1]} : vector<256x32xbf16> to vector<16x32xbf16>
    %22 = vector.extract_strided_slice %15 {offsets = [96, 0], sizes = [16, 32], strides = [1, 1]} : vector<256x32xbf16> to vector<16x32xbf16>
    %23 = vector.extract_strided_slice %15 {offsets = [112, 0], sizes = [16, 32], strides = [1, 1]} : vector<256x32xbf16> to vector<16x32xbf16>
    %24 = vector.extract_strided_slice %15 {offsets = [128, 0], sizes = [16, 32], strides = [1, 1]} : vector<256x32xbf16> to vector<16x32xbf16>
    %25 = vector.extract_strided_slice %15 {offsets = [144, 0], sizes = [16, 32], strides = [1, 1]} : vector<256x32xbf16> to vector<16x32xbf16>
    %26 = vector.extract_strided_slice %15 {offsets = [160, 0], sizes = [16, 32], strides = [1, 1]} : vector<256x32xbf16> to vector<16x32xbf16>
    %27 = vector.extract_strided_slice %15 {offsets = [176, 0], sizes = [16, 32], strides = [1, 1]} : vector<256x32xbf16> to vector<16x32xbf16>
    %28 = vector.extract_strided_slice %15 {offsets = [192, 0], sizes = [16, 32], strides = [1, 1]} : vector<256x32xbf16> to vector<16x32xbf16>
    %29 = vector.extract_strided_slice %15 {offsets = [208, 0], sizes = [16, 32], strides = [1, 1]} : vector<256x32xbf16> to vector<16x32xbf16>
    %30 = vector.extract_strided_slice %15 {offsets = [224, 0], sizes = [16, 32], strides = [1, 1]} : vector<256x32xbf16> to vector<16x32xbf16>
    %31 = vector.extract_strided_slice %15 {offsets = [240, 0], sizes = [16, 32], strides = [1, 1]} : vector<256x32xbf16> to vector<16x32xbf16>
    %32 = tpu.concatenate %16, %17, %18, %19, %20, %21, %22, %23, %24, %25, %26, %27, %28, %29, %30, %31 in 1 : vector<16x32xbf16>, vector<16x32xbf16>, vector<16x32xbf16>, vector<16x32xbf16>, vector<16x32xbf16>, vector<16x32xbf16>, vector<16x32xbf16>, vector<16x32xbf16>, vector<16x32xbf16>, vector<16x32xbf16>, vector<16x32xbf16>, vector<16x32xbf16>, vector<16x32xbf16>, vector<16x32xbf16>, vector<16x32xbf16>, vector<16x32xbf16> -> vector<16x512xbf16>
    %c0_13 = arith.constant 0 : index
    %c0_14 = arith.constant 0 : index
    %33 = vector.load %arg5[%c0_13, %c0_14] : memref<512x64xbf16, #tpu.memory_space<vmem>>, vector<512x64xbf16>
    %cst_15 = arith.constant dense<0.000000e+00> : vector<16x64xf32>
    %34 = tpu.matmul %32, %33, %cst_15 {dimension_numbers = #tpu.dot_dimension_numbers<[1], [0], [0], [1], [0, 0, 1, 1], [], []>} : vector<16x512xbf16>, vector<512x64xbf16>, vector<16x64xf32> -> vector<16x64xf32>
    %35 = vector.broadcast %1 : vector<1x64xf32> to vector<16x64xf32>
    %36 = arith.addf %34, %35 : vector<16x64xf32>
    %cst_16 = arith.constant 0.000000e+00 : f32
    %37 = vector.broadcast %cst_16 : f32 to vector<16x64xf32>
    %38 = arith.maximumf %36, %37 : vector<16x64xf32>
    %c0_17 = arith.constant 0 : index
    %c0_18 = arith.constant 0 : index
    %39 = vector.load %arg3[%c0_17, %c0_18] : memref<72x16xbf16, #tpu.memory_space<vmem>>, vector<72x16xbf16>
    %40 = arith.truncf %38 : vector<16x64xf32> to vector<16x64xbf16>
    %cst_19 = arith.constant dense<0.000000e+00> : vector<72x64xf32>
    %41 = tpu.matmul %39, %40, %cst_19 {dimension_numbers = #tpu.dot_dimension_numbers<[1], [0], [0], [1], [0, 0, 1, 1], [], []>} : vector<72x16xbf16>, vector<16x64xbf16>, vector<72x64xf32> -> vector<72x64xf32>
    %42 = arith.truncf %41 : vector<72x64xf32> to vector<72x64xbf16>
    %43 = vector.extract_strided_slice %42 {offsets = [0, 0], sizes = [8, 64], strides = [1, 1]} : vector<72x64xbf16> to vector<8x64xbf16>
    %44 = vector.extract_strided_slice %42 {offsets = [8, 0], sizes = [8, 64], strides = [1, 1]} : vector<72x64xbf16> to vector<8x64xbf16>
    %45 = vector.extract_strided_slice %42 {offsets = [16, 0], sizes = [8, 64], strides = [1, 1]} : vector<72x64xbf16> to vector<8x64xbf16>
    %46 = vector.extract_strided_slice %42 {offsets = [24, 0], sizes = [8, 64], strides = [1, 1]} : vector<72x64xbf16> to vector<8x64xbf16>
    %47 = vector.extract_strided_slice %42 {offsets = [32, 0], sizes = [8, 64], strides = [1, 1]} : vector<72x64xbf16> to vector<8x64xbf16>
    %48 = vector.extract_strided_slice %42 {offsets = [40, 0], sizes = [8, 64], strides = [1, 1]} : vector<72x64xbf16> to vector<8x64xbf16>
    %49 = vector.extract_strided_slice %42 {offsets = [48, 0], sizes = [8, 64], strides = [1, 1]} : vector<72x64xbf16> to vector<8x64xbf16>
    %50 = vector.extract_strided_slice %42 {offsets = [56, 0], sizes = [8, 64], strides = [1, 1]} : vector<72x64xbf16> to vector<8x64xbf16>
    %51 = vector.extract_strided_slice %42 {offsets = [64, 0], sizes = [8, 64], strides = [1, 1]} : vector<72x64xbf16> to vector<8x64xbf16>
    %52 = tpu.concatenate %43, %44, %45, %46, %47, %48, %49, %50, %51 in 1 : vector<8x64xbf16>, vector<8x64xbf16>, vector<8x64xbf16>, vector<8x64xbf16>, vector<8x64xbf16>, vector<8x64xbf16>, vector<8x64xbf16>, vector<8x64xbf16>, vector<8x64xbf16> -> vector<8x576xbf16>
    %c0_20 = arith.constant 0 : index
    %c0_21 = arith.constant 0 : index
    %53 = vector.load %arg6[%c0_20, %c0_21] : memref<576x64xbf16, #tpu.memory_space<vmem>>, vector<576x64xbf16>
    %cst_22 = arith.constant dense<0.000000e+00> : vector<8x64xf32>
    %54 = tpu.matmul %52, %53, %cst_22 {dimension_numbers = #tpu.dot_dimension_numbers<[1], [0], [0], [1], [0, 0, 1, 1], [], []>} : vector<8x576xbf16>, vector<576x64xbf16>, vector<8x64xf32> -> vector<8x64xf32>
    %55 = vector.broadcast %2 : vector<1x64xf32> to vector<8x64xf32>
    %56 = arith.addf %54, %55 : vector<8x64xf32>
    %cst_23 = arith.constant 0.000000e+00 : f32
    %57 = vector.broadcast %cst_23 : f32 to vector<8x64xf32>
    %58 = arith.maximumf %56, %57 : vector<8x64xf32>
    %59 = arith.truncf %58 : vector<8x64xf32> to vector<8x64xbf16>
    %c0_24 = arith.constant 0 : index
    %c0_25 = arith.constant 0 : index
    %60 = vector.load %arg7[%c0_24, %c0_25] : memref<64x512xbf16, #tpu.memory_space<vmem>>, vector<64x512xbf16>
    %cst_26 = arith.constant dense<0.000000e+00> : vector<8x512xf32>
    %61 = tpu.matmul %59, %60, %cst_26 {dimension_numbers = #tpu.dot_dimension_numbers<[1], [0], [0], [1], [0, 0, 1, 1], [], []>} : vector<8x64xbf16>, vector<64x512xbf16>, vector<8x512xf32> -> vector<8x512xf32>
    %62 = vector.broadcast %3 : vector<1x512xf32> to vector<8x512xf32>
    %63 = arith.addf %61, %62 : vector<8x512xf32>
    %cst_27 = arith.constant 0.000000e+00 : f32
    %64 = vector.broadcast %cst_27 : f32 to vector<8x512xf32>
    %65 = arith.maximumf %63, %64 : vector<8x512xf32>
    %66 = arith.truncf %65 : vector<8x512xf32> to vector<8x512xbf16>
    %c0_28 = arith.constant 0 : index
    %c0_29 = arith.constant 0 : index
    %67 = vector.load %arg8[%c0_28, %c0_29] : memref<512x7xbf16, #tpu.memory_space<vmem>>, vector<512x7xbf16>
    %cst_30 = arith.constant dense<0.000000e+00> : vector<8x7xf32>
    %68 = tpu.matmul %66, %67, %cst_30 {dimension_numbers = #tpu.dot_dimension_numbers<[1], [0], [0], [1], [0, 0, 1, 1], [], []>} : vector<8x512xbf16>, vector<512x7xbf16>, vector<8x7xf32> -> vector<8x7xf32>
    %69 = vector.broadcast %4 : vector<1x7xf32> to vector<8x7xf32>
    %70 = arith.addf %68, %69 : vector<8x7xf32>
    %71 = vector.extract_strided_slice %70 {offsets = [0, 0], sizes = [8, 1], strides = [1, 1]} : vector<8x7xf32> to vector<8x1xf32>
    %72 = vector.extract_strided_slice %70 {offsets = [0, 1], sizes = [8, 6], strides = [1, 1]} : vector<8x7xf32> to vector<8x6xf32>
    %cst_31 = arith.constant dense<0.000000e+00> : vector<8xf32>
    %73 = vector.multi_reduction <add>, %72, %cst_31 [1] : vector<8x6xf32> to vector<8xf32>
    %74 = vector.shape_cast %73 : vector<8xf32> to vector<8x1xf32>
    %cst_32 = arith.constant 0.166666672 : f32
    %75 = vector.broadcast %cst_32 : f32 to vector<8x1xf32>
    %76 = arith.mulf %74, %75 : vector<8x1xf32>
    %77 = vector.broadcast %76 : vector<8x1xf32> to vector<8x6xf32>
    %78 = arith.subf %72, %77 : vector<8x6xf32>
    %79 = vector.broadcast %71 : vector<8x1xf32> to vector<8x6xf32>
    %80 = arith.addf %79, %78 : vector<8x6xf32>
    %81 = vector.extract_strided_slice %80 {offsets = [0, 0], sizes = [1, 6], strides = [1, 1]} : vector<8x6xf32> to vector<1x6xf32>
    %c0_33 = arith.constant 0 : index
    %c0_34 = arith.constant 0 : index
    %c0_35 = arith.constant 0 : index
    %82 = vector.load %arg10[%c0_33, %c0_34, %c0_35] : memref<1x1x6xf32, #tpu.memory_space<vmem>>, vector<1x1x6xf32>
    %83 = vector.shape_cast %82 : vector<1x1x6xf32> to vector<1x6xf32>
    %84 = vector.shape_cast %81 : vector<1x6xf32> to vector<1x1x6xf32>
    tpu.vector_store %arg10[%c0_33, %c0_34, %c0_35], %84 {strides = array<i32>} : memref<1x1x6xf32, #tpu.memory_space<vmem>>, vector<1x1x6xf32>,
    return
  }
  func.func @transform_0(%arg0: i32) -> (i32, i32) {
    %c0_i32 = arith.constant 0 : i32
    %c0_i32_0 = arith.constant 0 : i32
    return %arg0, %c0_i32 : i32, i32
  }
  func.func @transform_1(%arg0: i32) -> (i32, i32) {
    %c0_i32 = arith.constant 0 : i32
    %c0_i32_0 = arith.constant 0 : i32
    %c0_i32_1 = arith.constant 0 : i32
    return %c0_i32, %c0_i32_0 : i32, i32
  }
  func.func @transform_2(%arg0: i32) -> (i32, i32) {
    %c0_i32 = arith.constant 0 : i32
    %c0_i32_0 = arith.constant 0 : i32
    %c0_i32_1 = arith.constant 0 : i32
    return %c0_i32, %c0_i32_0 : i32, i32
  }
  func.func @transform_3(%arg0: i32) -> (i32, i32) {
    %c0_i32 = arith.constant 0 : i32
    %c0_i32_0 = arith.constant 0 : i32
    %c0_i32_1 = arith.constant 0 : i32
    return %c0_i32, %c0_i32_0 : i32, i32
  }
  func.func @transform_4(%arg0: i32) -> (i32, i32) {
    %c0_i32 = arith.constant 0 : i32
    %c0_i32_0 = arith.constant 0 : i32
    %c0_i32_1 = arith.constant 0 : i32
    return %c0_i32, %c0_i32_0 : i32, i32
  }
  func.func @transform_5(%arg0: i32) -> (i32, i32) {
    %c0_i32 = arith.constant 0 : i32
    %c0_i32_0 = arith.constant 0 : i32
    %c0_i32_1 = arith.constant 0 : i32
    return %c0_i32, %c0_i32_0 : i32, i32
  }
  func.func @transform_6(%arg0: i32) -> (i32, i32) {
    %c0_i32 = arith.constant 0 : i32
    %c0_i32_0 = arith.constant 0 : i32
    %c0_i32_1 = arith.constant 0 : i32
    return %c0_i32, %c0_i32_0 : i32, i32
  }
  func.func @transform_7(%arg0: i32) -> (i32, i32) {
    %c0_i32 = arith.constant 0 : i32
    %c0_i32_0 = arith.constant 0 : i32
    %c0_i32_1 = arith.constant 0 : i32
    return %c0_i32, %c0_i32_0 : i32, i32
  }
  func.func @transform_8(%arg0: i32) -> (i32, i32) {
    %c0_i32 = arith.constant 0 : i32
    %c0_i32_0 = arith.constant 0 : i32
    %c0_i32_1 = arith.constant 0 : i32
    return %c0_i32, %c0_i32_0 : i32, i32
  }
  func.func @transform_9(%arg0: i32) -> (i32, i32, i32) {
    %c0_i32 = arith.constant 0 : i32
    %c0_i32_0 = arith.constant 0 : i32
    %c0_i32_1 = arith.constant 0 : i32
    return %arg0, %c0_i32, %c0_i32_0 : i32, i32, i32
  }
}

</mosaic_0001>

<bundles_post_ra>
// kernel: dual_dqn_forward.1
= control target key start
LH: loop header
LB: loop body
LE: loop exit
PB: predicated region body
PF: predicated region fallthrough
CT: control target
= control target key end

     0   :  { %14 = vsyncpa [#allocation3], 0  ;;  %s4116_s0 = inlined_call_operand.vmem [shape: bf16[128,256], index: 0, kind: input, shape index: {}]   ;;  %s4117_s1 = inlined_call_operand.vmem [shape: bf16[256,64], index: 1, kind: input, shape index: {}]   ;;  %s4118_s2 = inlined_call_operand.vmem [shape: bf16[72,16], index: 2, kind: input, shape index: {}]   ;;  %s4119_s3 = inlined_call_operand.vmem [shape: bf16[256,32], index: 3, kind: input, shape index: {}]   ;;  %s4120_s4 = inlined_call_operand.vmem [shape: bf16[512,64], index: 4, kind: input, shape index: {}]   ;;  %s4121_s5 = inlined_call_operand.vmem [shape: bf16[576,64], index: 5, kind: input, shape index: {}]   ;;  %s4122_s6 = inlined_call_operand.vmem [shape: bf16[64,512], index: 6, kind: input, shape index: {}]   ;;  %s4123_s7 = inlined_call_operand.vmem [shape: bf16[512,7], index: 7, kind: input, shape index: {}]   ;;  %s4124_s8 = inlined_call_operand.vmem [shape: f32[1,1024], index: 8, kind: input, shape index: {}]   ;;  %s4125_s9 = inlined_call_operand.hbm [shape: f32[2,1,6], index: 9, kind: output, shape index: {}]  }
   0x1   :  { %16 = vsyncpa [#allocation3 + $0x1], 0  ;;  %s3387_s30 = smov 0   ;;  %s3389_s10 = smov 0  }
   0x2   :  { %s3391_s11 = smov 0   ;;  %s3393_s12 = smov 0  }
   0x3 LB: > { %s3408_s13 = sadd.s32 4294967295, %s3330_s12   ;;  %s2383_s14 = sadd.s32 4294967294, %s3330_s12   ;;  %s3330_s12 = sphi %s3393_s12, %s4133_s12   ;;  %s3326_s11 = sphi %s3391_s11, %s4132_s11   ;;  %s3322_s10 = sphi %s3389_s10, %s4131_s10   ;;  %s3318_s30 = sphi %s3387_s30, %s4130_s30  }
   0x4   : > { %s3412_s15 = sadd.s32 1, %s3330_s12   ;;  %s223_s16 = sadd.s32 1, %s3326_s11 }
   0x5   : > { %s220_s17 = ssub.s32 %s3330_s12, %s3412_s15  ;;  %p233_p0 = scmp.ne.s32.totalorder %s3326_s11, %s3322_s10 }
   0x6   : > { %p221_p1 = scmp.eq.s32.totalorder %s220_s17, 0  ;;  %p234_p2 = scmp.eq.s32.totalorder %s3408_s13, 1 }
   0x7   : > { %p239_p3 = scmp.ne.s32.totalorder %s3322_s10, %s3318_s30  ;;  %p240_p4 = scmp.eq.s32.totalorder %s2383_s14, 1 }
   0x8   : > { %s3423_s18 = scalar_select %p221_p1, %s3326_s11, %s223_s16  }
   0x9   : > { %p3425_p5 = por %p234_p2, %p233_p0  ;;  %p3429_p6 = por %p240_p4, %p239_p3 }
   0xa   : > { %4126 = sst [smem:[#allocation5_spill]] %s3423_s18  ;;  %p2386_p7 = scmp.ge.s32.totalorder %s3330_s12, 1 }
   0xb   : > { %p292_p8 = scmp.lt.s32.totalorder %s3330_s12, 3 }
   0xd   : > { %p293_p9 = pnand %p2386_p7, %p292_p8 }
   0xe   : > { %s2387_s21 = sshll.u32 (!%p293_p9), %s3408_s13, 3  ;;  %s3333_s22 = smov (!%p293_p9), 64  }
   0xf   : > { %296 = sbr.rel (%p293_p9) target bundleno = 1963 (0x7ab), region = 56  ;;  %p329_p10 = scmp.lt.s32.totalorder (!%p293_p9), %s2387_s21, 15 }
  0x10   : > { %s3334_s25 = smov (!%p293_p9), 96   ;;  %s3336_s18 = smov (!%p293_p9), 127  }
  0x11   : > { %s2324_s24 = scalar_lea.hbm (!%p293_p9), %s4125_s9, %s3408_s13  ;;  %s3288_s13 = scalar_lea.hbm (!%p293_p9), %s4125_s9, 2 }
  0x12   : > { %s2328_s28 = sshll.u32 (!%p293_p9), %s2324_s24, 4  ;;  %s2329_s28 = int_to_ptr.hbm [resolvable:$true] %s2328_s28 }
  0x14   : > { %v3074_v0 = vld [vmem:[%s4119_s3 + $0x38] sm:$0xff]  ;;  %v3073_v2 = vld [vmem:[%s4119_s3 + $0x30] sm:$0xff]  ;;  %v3072_v4 = vld [vmem:[%s4119_s3 + $0x28] sm:$0xff]  ;;  %s4135_s21 = smov (!%p329_p10, %s2387_s21), 15  ;;  %vm702_vm0 = vcmask 523264   ;;  %vm976_vm1 = vcmask 261120  }
  0x15   : > { %v3082_v1 = vld [vmem:[%s4119_s3 + $0x78] sm:$0xff]  ;;  %520 = vmatpush.bf16.msra.mxu0 %v3074_v0  ;;  %v3081_v3 = vld [vmem:[%s4119_s3 + $0x70] sm:$0xff]  ;;  %v3080_v5 = vld [vmem:[%s4119_s3 + $0x68] sm:$0xff]  ;;  %s3058_s23 = sshll.u32 %s4135_s21, 3  ;;  %s3332_s21 = smov 32   ;;  %vm982_vm2 = vcmask 785408  }
  0x16   : > { %549 = vmatpush.bf16.msra.mxu1 %v3082_v1  ;;  %v3071_v6 = vld [vmem:[%s4119_s3 + $0x20] sm:$0xff]  ;;  %v3070_v8 = vld [vmem:[%s4119_s3 + $0x18] sm:$0xff]  ;;  %v3069_v10 = vld [vmem:[%s4119_s3 + $0x10] sm:$0xff]  ;;  %s3481_s14 = scalar_lea.vmem %s4116_s0, %s3058_s23  ;;  %vm1360_vm3 = vcmask 130048   ;;  %vm2298_vm4 = vcmask 48128   ;;  %vm2313_vm5 = vcmask 40960  }
  0x17   : > { %v3079_v7 = vld [vmem:[%s4119_s3 + $0x60] sm:$0xff]  ;;  %v3078_v9 = vld [vmem:[%s4119_s3 + $0x58] sm:$0xff]  ;;  %v3077_v11 = vld [vmem:[%s4119_s3 + $0x50] sm:$0xff] }
  0x18   : > { %v3068_v12 = vld [vmem:[%s4119_s3 + $0x8] sm:$0xff]  ;;  %v3067_v14 = vld [vmem:[%s4119_s3] sm:$0xff]  ;;  %v2400_v22 = vld [vmem:[%s3481_s14 + $0x10] sm:$0xf] }
  0x19   : > { %521 = vmatpush.bf16.msra.mxu0 %v3073_v2  ;;  %v3076_v13 = vld [vmem:[%s4119_s3 + $0x48] sm:$0xff]  ;;  %v3075_v15 = vld [vmem:[%s4119_s3 + $0x40] sm:$0xff]  ;;  %v3062_v23 = vld [vmem:[%s3481_s14 + $0x14] sm:$0xf0] }
  0x1a   : > { %550 = vmatpush.bf16.msra.mxu1 %v3081_v3  ;;  %v2392_v16 = vld [vmem:[%s3481_s14] sm:$0xf]  ;;  %v3060_v17 = vld [vmem:[%s3481_s14 + $0x4] sm:$0xf0]  ;;  %v3059_v18 = vld [vmem:[%s3481_s14 + $0x4] sm:$0xf]  ;;  %v2401_v26 = vor.u32 %v3062_v23, %v2400_v22 }
  0x1b   : > { %v2394_v19 = vld [vmem:[%s3481_s14 + $0x8] sm:$0xf0]  ;;  %v2393_v20 = vor.u32 %v3060_v17, %v2392_v16  ;;  %v3061_v24 = vld [vmem:[%s3481_s14 + $0x14] sm:$0xf]  ;;  %v2402_v25 = vld [vmem:[%s3481_s14 + $0x18] sm:$0xf0] }
  0x1c   : > { %v2397_v21 = vor.u32 %v3059_v18, %v2394_v19  ;;  %v2405_v27 = vor.u32 %v3061_v24, %v2402_v25  ;;  %v2408_v28 = vld [vmem:[%s3481_s14 + $0x20] sm:$0xf]  ;;  %v3064_v29 = vld [vmem:[%s3481_s14 + $0x24] sm:$0xf0]  ;;  %v3063_v30 = vld [vmem:[%s3481_s14 + $0x24] sm:$0xf] }
  0x1d   : > { %522 = vmatpush.bf16.msra.mxu0 %v3072_v4  ;;  %v2410_v31 = vld [vmem:[%s3481_s14 + $0x28] sm:$0xf0]  ;;  %v2409_v32 = vor.u32 %v3064_v29, %v2408_v28  ;;  %v2416_v34 = vld [vmem:[%s3481_s14 + $0x30] sm:$0xf]  ;;  %v3066_v35 = vld [vmem:[%s3481_s14 + $0x34] sm:$0xf0] }
  0x1e   : > { %551 = vmatpush.bf16.msra.mxu1 %v3080_v5  ;;  %v2413_v33 = vor.u32 %v3063_v30, %v2410_v31  ;;  %v3065_v36 = vld [vmem:[%s3481_s14 + $0x34] sm:$0xf]  ;;  %v2418_v37 = vld [vmem:[%s3481_s14 + $0x38] sm:$0xf0]  ;;  %v2417_v38 = vor.u32 %v3066_v35, %v2416_v34  ;;  %v3264_v40 = vld [vmem:[%s4124_s8] ss:$0 sm:$0xff] }
  0x1f   : > { %v2421_v39 = vor.u32 %v3065_v36, %v2418_v37  ;;  %v3084_v22 = vld [vmem:[%s4117_s1 + $0x8] sm:$0xff]  ;;  %v3085_v23 = vld [vmem:[%s4117_s1 + $0x10] sm:$0xff]  ;;  %v3086_v24 = vld [vmem:[%s4117_s1 + $0x18] sm:$0xff] }
  0x20   : > { %v3087_v25 = vld [vmem:[%s4117_s1 + $0x20] sm:$0xff]  ;;  %v3090_v28 = vld [vmem:[%s4117_s1 + $0x38] sm:$0xff]  ;;  %v3092_v34 = vld [vmem:[%s4117_s1 + $0x48] sm:$0xff] }
  0x21   : > { %523 = vmatpush.bf16.msra.mxu0 %v3071_v6  ;;  %v3091_v29 = vld [vmem:[%s4117_s1 + $0x40] sm:$0xff] }
  0x22   : > { %552 = vmatpush.bf16.msra.mxu1 %v3079_v7 }
  0x25   : > { %524 = vmatpush.bf16.msra.mxu0 %v3070_v8 }
  0x26   : > { %553 = vmatpush.bf16.msra.mxu1 %v3078_v9 }
  0x29   : > { %525 = vmatpush.bf16.msra.mxu0 %v3069_v10 }
  0x2a   : > { %554 = vmatpush.bf16.msra.mxu1 %v3077_v11 }
  0x2d   : > { %526 = vmatpush.bf16.msra.mxu0 %v3068_v12 }
  0x2e   : > { %555 = vmatpush.bf16.msra.mxu1 %v3076_v13 }
  0x31   : > { %527 = vmatpush.bf16.msra.mxu0 %v3067_v14 }
  0x32   : > { %556 = vmatpush.bf16.msra.mxu1 %v3075_v15 }
  0x34   : > { %528 = vmatmul.bf16.vlgmr.msra.gmra.mxu0 %v2393_v20 }
  0x35   : > { %557 = vmatmul.bf16.vlgmr.msra.gmra.mxu1 %v2397_v21  ;;  %v3083_v21 = vld [vmem:[%s4117_s1] sm:$0xff] }
  0x44   : > { %533 = vmatmul.bf16.gmra.mxu0 %v2401_v26  ;;  %v3088_v26 = vld [vmem:[%s4117_s1 + $0x28] sm:$0xff] }
  0x45   : > { %562 = vmatmul.bf16.gmra.mxu1 %v2405_v27  ;;  %v3089_v27 = vld [vmem:[%s4117_s1 + $0x30] sm:$0xff] }
  0x54   : > { %538 = vmatmul.bf16.gmra.mxu0 %v2409_v32 }
  0x55   : > { %567 = vmatmul.bf16.gmra.mxu1 %v2413_v33 }
  0x64   : > { %543 = vmatmul.bf16.gmra.mxu0 %v2417_v38 }
  0x65   : > { %572 = vmatmul.bf16.gmra.mxu1 %v2421_v39 }
  0xb1   : > { %v529_v41 = vpop.f32.mrf.mxu0 }
  0xb2   : > { %v558_v42 = vpop.f32.mrf.mxu1  ;;  %v530_v43 = vadd.f32 %v3264_v40, %v529_v41 }
  0xb4   : > { %v559_v44 = vadd.f32 %v558_v42, %v530_v43  ;;  %v3093_v42 = vld [vmem:[%s4117_s1 + $0x50] sm:$0xff] }
  0xb6   : > { %v578_v19 = vmax.f32 %v559_v44, 0.0 }
  0xb9   : > { %v531_v45 = vpop.f32.mrf.mxu0 }
  0xba   : > { %v560_v46 = vpop.f32.mrf.mxu1  ;;  %v532_v7 = vadd.f32 %v3264_v40, %v531_v45 }
  0xbc   : > { %v561_v13 = vadd.f32 %v560_v46, %v532_v7 }
  0xbe   : > { %v579_v17 = vmax.f32 %v561_v13, 0.0 }
  0xc0   : > { %v618_v20 = vpack.c.bf16 %v579_v17, %v578_v19 }
  0xc1   : > { %v534_v47 = vpop.f32.mrf.mxu0 }
  0xc2   : > { %v563_v48 = vpop.f32.mrf.mxu1  ;;  %v535_v3 = vadd.f32 %v3264_v40, %v534_v47 }
  0xc4   : > { %v564_v11 = vadd.f32 %v563_v48, %v535_v3 }
  0xc6   : > { %v580_v16 = vmax.f32 %v564_v11, 0.0 }
  0xc9   : > { %v536_v49 = vpop.f32.mrf.mxu0 }
  0xca   : > { %v565_v50 = vpop.f32.mrf.mxu1  ;;  %v537_v0 = vadd.f32 %v3264_v40, %v536_v49 }
  0xcc   : > { %v566_v8 = vadd.f32 %v565_v50, %v537_v0  ;;  %v3094_v50 = vld [vmem:[%s4117_s1 + $0x58] sm:$0xff] }
  0xce   : > { %v581_v14 = vmax.f32 %v566_v8, 0.0 }
  0xd0   : > { %v619_v18 = vpack.c.bf16 %v581_v14, %v580_v16 }
  0xd1   : > { %v539_v51 = vpop.f32.mrf.mxu0 }
  0xd2   : > { %v568_v52 = vpop.f32.mrf.mxu1  ;;  %v540_v60 = vadd.f32 %v3264_v40, %v539_v51 }
  0xd4   : > { %v569_v4 = vadd.f32 %v568_v52, %v540_v60 }
  0xd6   : > { %v582_v12 = vmax.f32 %v569_v4, 0.0 }
  0xd9   : > { %v541_v53 = vpop.f32.mrf.mxu0 }
  0xda   : > { %v570_v54 = vpop.f32.mrf.mxu1  ;;  %v542_v58 = vadd.f32 %v3264_v40, %v541_v53 }
  0xdc   : > { %v571_v1 = vadd.f32 %v570_v54, %v542_v58  ;;  %v3095_v58 = vld [vmem:[%s4117_s1 + $0x60] sm:$0xff] }
  0xde   : > { %v583_v9 = vmax.f32 %v571_v1, 0.0 }
  0xe0   : > { %v620_v15 = vpack.c.bf16 %v583_v9, %v582_v12 }
  0xe1   : > { %v544_v55 = vpop.f32.mrf.mxu0 }
  0xe2   : > { %v573_v56 = vpop.f32.mrf.mxu1  ;;  %v545_v57 = vadd.f32 %v3264_v40, %v544_v55 }
  0xe4   : > { %v574_v61 = vadd.f32 %v573_v56, %v545_v57 }
  0xe6   : > { %v584_v5 = vmax.f32 %v574_v61, 0.0 }
  0xe9   : > { %v546_v59 = vpop.f32.mrf.mxu0 }
  0xea   : > { %v547_v62 = vadd.f32 %v3264_v40, %v546_v59  ;;  %v575_v63 = vpop.f32.mrf.mxu1 }
  0xec   : > { %v576_v2 = vadd.f32 %v575_v63, %v547_v62 }
  0xee   : > { %v585_v6 = vmax.f32 %v576_v2, 0.0  ;;  %v3096_v2 = vld [vmem:[%s4117_s1 + $0x68] sm:$0xff] }
  0xf0   : > { %v621_v10 = vpack.c.bf16 %v585_v6, %v584_v5 }
  0xf2   : > { %755 = vmatpush.bf16.msra.mxu2 %v621_v10  ;;  %v3097_v10 = vld [vmem:[%s4117_s1 + $0x70] sm:$0xff] }
  0xf6   : > { %756 = vmatpush.bf16.msra.mxu2 %v620_v15 }
  0xfa   : > { %757 = vmatpush.bf16.msra.mxu2 %v619_v18  ;;  %v3098_v18 = vld [vmem:[%s4117_s1 + $0x78] sm:$0xff] }
  0xfe   : > { %758 = vmatpush.bf16.msra.mxu2 %v618_v20 }
 0x101   : > { %2550 = vmatmul.msk.bf16.vlgmr.msra.gmra.mxu2 %vm702_vm0, %v3083_v21 }
 0x111   : > { %2551 = vmatmul.msk.bf16.gmra.mxu2 %vm702_vm0, %v3084_v22 }
 0x121   : > { %2552 = vmatmul.msk.bf16.gmra.mxu2 %vm702_vm0, %v3085_v23  ;;  %v3106_v23 = vld [vmem:[%s4120_s4 + $0x38] sm:$0xff] }
 0x122   : > { %1269 = vmatpush.bf16.msra.mxu3 %v3106_v23 }
 0x131   : > { %2553 = vmatmul.msk.bf16.gmra.mxu2 %vm702_vm0, %v3086_v24  ;;  %v3105_v24 = vld [vmem:[%s4120_s4 + $0x30] sm:$0xff] }
 0x132   : > { %1270 = vmatpush.bf16.msra.mxu3 %v3105_v24 }
 0x141   : > { %2554 = vmatmul.msk.bf16.gmra.mxu2 %vm702_vm0, %v3087_v25 }
 0x151   : > { %2555 = vmatmul.msk.bf16.gmra.mxu2 %vm702_vm0, %v3088_v26 }
 0x161   : > { %2556 = vmatmul.msk.bf16.gmra.mxu2 %vm702_vm0, %v3089_v27 }
 0x171   : > { %2557 = vmatmul.msk.bf16.gmra.mxu2 %vm702_vm0, %v3090_v28  ;;  %v3104_v28 = vld [vmem:[%s4120_s4 + $0x28] sm:$0xff] }
 0x172   : > { %1271 = vmatpush.bf16.msra.mxu3 %v3104_v28 }
 0x181   : > { %2558 = vmatmul.msk.bf16.gmra.mxu2 %vm702_vm0, %v3091_v29 }
 0x184   : > { %v760_v30 = vpop.f32.mrf.mxu2 }
 0x185   : > { %v840_v31 = vpack.c.bf16 %v760_v30, %v760_v30 }
 0x187   : > { %v3547_v35 = vunpack.c.l.b16 %v840_v31 }
 0x18c   : > { %v762_v32 = vpop.f32.mrf.mxu2 }
 0x18d   : > { %v841_v33 = vpack.c.bf16 %v762_v32, %v762_v32  ;;  %v3103_v32 = vld [vmem:[%s4120_s4 + $0x20] sm:$0xff] }
 0x18e   : > { %1272 = vmatpush.bf16.msra.mxu3 %v3103_v32 }
 0x18f   : > { %v3549_v36 = vunpack.c.l.b16 %v841_v33 }
 0x191   : > { %v876_v37 = vpack.c.b16 %v3549_v36, %v3547_v35  ;;  %2559 = vmatmul.msk.bf16.gmra.mxu2 %vm702_vm0, %v3092_v34  ;;  %v3102_v34 = vld [vmem:[%s4120_s4 + $0x18] sm:$0xff] }
 0x192   : > { %1273 = vmatpush.bf16.msra.mxu3 %v3102_v34 }
 0x194   : > { %v765_v38 = vpop.f32.mrf.mxu2 }
 0x195   : > { %v842_v39 = vpack.c.bf16 %v765_v38, %v765_v38  ;;  %v3101_v38 = vld [vmem:[%s4120_s4 + $0x10] sm:$0xff] }
 0x196   : > { %1274 = vmatpush.bf16.msra.mxu3 %v3101_v38 }
 0x197   : > { %v879_v43 = vunpack.c.l.b16 %v842_v39 }
 0x19c   : > { %v767_v40 = vpop.f32.mrf.mxu2 }
 0x19d   : > { %v843_v41 = vpack.c.bf16 %v767_v40, %v767_v40 }
 0x19f   : > { %v880_v44 = vunpack.c.l.b16 %v843_v41 }
 0x1a1   : > { %2560 = vmatmul.msk.bf16.gmra.mxu2 %vm702_vm0, %v3093_v42  ;;  %v881_v45 = vpack.c.b16 %v880_v44, %v879_v43  ;;  %v3100_v42 = vld [vmem:[%s4120_s4 + $0x8] sm:$0xff] }
 0x1a2   : > { %1275 = vmatpush.bf16.msra.mxu3 %v3100_v42 }
 0x1a3   : > { %882 = vrot.lane.b32.xlu0 %v881_v45, %s3332_s21 }
 0x1a4   : > { %v770_v46 = vpop.f32.mrf.mxu2 }
 0x1a5   : > { %v844_v47 = vpack.c.bf16 %v770_v46, %v770_v46  ;;  %v3099_v46 = vld [vmem:[%s4120_s4] sm:$0xff] }
 0x1a6   : > { %1276 = vmatpush.bf16.msra.mxu3 %v3099_v46 }
 0x1a7   : > { %v886_v51 = vunpack.c.l.b16 %v844_v47 }
 0x1ac   : > { %v772_v48 = vpop.f32.mrf.mxu2 }
 0x1ad   : > { %v845_v49 = vpack.c.bf16 %v772_v48, %v772_v48 }
 0x1af   : > { %v887_v52 = vunpack.c.l.b16 %v845_v49 }
 0x1b1   : > { %2561 = vmatmul.msk.bf16.gmra.mxu2 %vm702_vm0, %v3094_v50  ;;  %v888_v53 = vpack.c.b16 %v887_v52, %v886_v51  ;;  %v3114_v51 = vld [vmem:[%s4120_s4 + $0x78] sm:$0xff] }
 0x1b2   : > { %1283 = vmatpush.bf16.msrb.mxu3 %v3114_v51 }
 0x1b3   : > { %889 = vrot.lane.b32.xlu0 %v888_v53, %s3333_s22 }
 0x1b4   : > { %v775_v54 = vpop.f32.mrf.mxu2 }
 0x1b5   : > { %v846_v55 = vpack.c.bf16 %v775_v54, %v775_v54 }
 0x1b7   : > { %v893_v59 = vunpack.c.l.b16 %v846_v55  ;;  %v3113_v55 = vld [vmem:[%s4120_s4 + $0x70] sm:$0xff] }
 0x1b8   : > { %1284 = vmatpush.bf16.msrb.mxu3 %v3113_v55 }
 0x1bc   : > { %v777_v56 = vpop.f32.mrf.mxu2 }
 0x1bd   : > { %v847_v57 = vpack.c.bf16 %v777_v56, %v777_v56 }
 0x1bf   : > { %v894_v60 = vunpack.c.l.b16 %v847_v57  ;;  %v3112_v57 = vld [vmem:[%s4120_s4 + $0x68] sm:$0xff] }
 0x1c0   : > { %1285 = vmatpush.bf16.msrb.mxu3 %v3112_v57 }
 0x1c1   : > { %2562 = vmatmul.msk.bf16.gmra.mxu2 %vm702_vm0, %v3095_v58  ;;  %v895_v61 = vpack.c.b16 %v894_v60, %v893_v59  ;;  %v3111_v59 = vld [vmem:[%s4120_s4 + $0x60] sm:$0xff] }
 0x1c3   : > { %896 = vrot.lane.b32.xlu1 %v895_v61, %s3334_s25 }
 0x1c4   : > { %v780_v62 = vpop.f32.mrf.mxu2  ;;  %1286 = vmatpush.bf16.msrb.mxu3 %v3111_v59  ;;  %v3116_v59 = vld [vmem:[%s4120_s4 + $0x88] sm:$0xff] }
 0x1c5   : > { %v848_v63 = vpack.c.bf16 %v780_v62, %v780_v62 }
 0x1c7   : > { %v3572_v3 = vunpack.c.l.b16 %v848_v63  ;;  %v3110_v63 = vld [vmem:[%s4120_s4 + $0x58] sm:$0xff] }
 0x1c8   : > { %1287 = vmatpush.bf16.msrb.mxu3 %v3110_v63  ;;  %v3130_v63 = vld [vmem:[%s4120_s4 + $0xf8] sm:$0xff] }
 0x1c9   : > { %1311 = vmatpush.bf16.msrb.mxu1 %v3130_v63 }
 0x1cc   : > { %v782_v0 = vpop.f32.mrf.mxu2 }
 0x1cd   : > { %v849_v1 = vpack.c.bf16 %v782_v0, %v782_v0 }
 0x1cf   : > { %v3574_v4 = vunpack.c.l.b16 %v849_v1 }
 0x1d1   : > { %v902_v5 = vpack.c.b16 %v3574_v4, %v3572_v3  ;;  %2563 = vmatmul.msk.bf16.gmra.mxu2 %vm702_vm0, %v3096_v2  ;;  %v3122_v3 = vld [vmem:[%s4120_s4 + $0xb8] sm:$0xff] }
 0x1d2   : > { %1297 = vmatpush.bf16.msrb.mxu0 %v3122_v3  ;;  %v3133_v3 = vld [vmem:[%s4118_s2 + $0x10] sm:$0xff] }
 0x1d4   : > { %v785_v6 = vpop.f32.mrf.mxu2 }
 0x1d5   : > { %v850_v7 = vpack.c.bf16 %v785_v6, %v785_v6 }
 0x1d7   : > { %v905_v11 = vunpack.c.l.b16 %v850_v7  ;;  %v3109_v7 = vld [vmem:[%s4120_s4 + $0x50] sm:$0xff] }
 0x1d8   : > { %1288 = vmatpush.bf16.msrb.mxu3 %v3109_v7 }
 0x1dc   : > { %v787_v8 = vpop.f32.mrf.mxu2 }
 0x1dd   : > { %v851_v9 = vpack.c.bf16 %v787_v8, %v787_v8 }
 0x1df   : > { %v906_v12 = vunpack.c.l.b16 %v851_v9 }
 0x1e1   : > { %v907_v13 = vpack.c.b16 %v906_v12, %v905_v11  ;;  %2564 = vmatmul.msk.bf16.gmra.mxu2 %vm702_vm0, %v3097_v10 }
 0x1e3   : > { %908 = vrot.lane.b32.xlu1 %v907_v13, %s3332_s21  ;;  %v3108_v13 = vld [vmem:[%s4120_s4 + $0x48] sm:$0xff] }
 0x1e4   : > { %v790_v14 = vpop.f32.mrf.mxu2  ;;  %1289 = vmatpush.bf16.msrb.mxu3 %v3108_v13 }
 0x1e5   : > { %v852_v15 = vpack.c.bf16 %v790_v14, %v790_v14  ;;  %v3107_v14 = vld [vmem:[%s4120_s4 + $0x40] sm:$0xff] }
 0x1e7   : > { %v912_v19 = vunpack.c.l.b16 %v852_v15 }
 0x1e8   : > { %1290 = vmatpush.bf16.msrb.mxu3 %v3107_v14 }
 0x1ec   : > { %v792_v16 = vpop.f32.mrf.mxu2 }
 0x1ed   : > { %v853_v17 = vpack.c.bf16 %v792_v16, %v792_v16 }
 0x1ef   : > { %v913_v20 = vunpack.c.l.b16 %v853_v17 }
 0x1f1   : > { %2565 = vmatmul.msk.bf16.gmra.mxu2 %vm702_vm0, %v3098_v18  ;;  %v914_v21 = vpack.c.b16 %v913_v20, %v912_v19 }
 0x1f3   : > { %915 = vrot.lane.b32.xlu2 %v914_v21, %s3333_s22 }
 0x1f4   : > { %v795_v22 = vpop.f32.mrf.mxu2 }
 0x1f5   : > { %v854_v25 = vpack.c.bf16 %v795_v22, %v795_v22 }
 0x1f7   : > { %v919_v29 = vunpack.c.l.b16 %v854_v25 }
 0x1fc   : > { %v797_v26 = vpop.f32.mrf.mxu2 }
 0x1fd   : > { %v855_v27 = vpack.c.bf16 %v797_v26, %v797_v26 }
 0x1ff   : > { %v920_v30 = vunpack.c.l.b16 %v855_v27 }
 0x201   : > { %v921_v31 = vpack.c.b16 %v920_v30, %v919_v29 }
 0x203   : > { %922 = vrot.lane.b32.xlu2 %v921_v31, %s3334_s25 }
 0x204   : > { %v800_v33 = vpop.f32.mrf.mxu2 }
 0x205   : > { %v856_v39 = vpack.c.bf16 %v800_v33, %v800_v33 }
 0x207   : > { %v3611_v43 = vunpack.c.l.b16 %v856_v39 }
 0x20c   : > { %v802_v40 = vpop.f32.mrf.mxu2 }
 0x20d   : > { %v857_v41 = vpack.c.bf16 %v802_v40, %v802_v40 }
 0x20f   : > { %v3613_v44 = vunpack.c.l.b16 %v857_v41  ;;  %v3120_v41 = vld [vmem:[%s4120_s4 + $0xa8] sm:$0xff] }
 0x211   : > { %v928_v45 = vpack.c.b16 %v3613_v44, %v3611_v43  ;;  %v3125_v43 = vld [vmem:[%s4120_s4 + $0xd0] sm:$0xff]  ;;  %v3124_v44 = vld [vmem:[%s4120_s4 + $0xc8] sm:$0xff] }
 0x214   : > { %v805_v47 = vpop.f32.mrf.mxu2 }
 0x215   : > { %v858_v48 = vpack.c.bf16 %v805_v47, %v805_v47  ;;  %v883_v58 = vpop.permute.xlu0 %882 }
 0x216   : > { %v979_v8 = vsel %vm976_vm1, %v876_v37, %v883_v58 }
 0x217   : > { %v931_v52 = vunpack.c.l.b16 %v858_v48  ;;  %v3119_v48 = vld [vmem:[%s4120_s4 + $0xa0] sm:$0xff] }
 0x21c   : > { %v807_v49 = vpop.f32.mrf.mxu2 }
 0x21d   : > { %v859_v50 = vpack.c.bf16 %v807_v49, %v807_v49 }
 0x21f   : > { %v932_v53 = vunpack.c.l.b16 %v859_v50 }
 0x221   : > { %v933_v54 = vpack.c.b16 %v932_v53, %v931_v52  ;;  %v3118_v53 = vld [vmem:[%s4120_s4 + $0x98] sm:$0xff] }
 0x223   : > { %934 = vrot.lane.b32.xlu0 %v933_v54, %s3332_s21  ;;  %v3117_v54 = vld [vmem:[%s4120_s4 + $0x90] sm:$0xff] }
 0x224   : > { %v810_v56 = vpop.f32.mrf.mxu2 }
 0x225   : > { %v860_v60 = vpack.c.bf16 %v810_v56, %v810_v56  ;;  %v890_v6 = vpop.permute.xlu0 %889 }
 0x226   : > { %v981_v10 = vsel %vm702_vm0, %v979_v8, %v890_v6  ;;  %v3127_v8 = vld [vmem:[%s4120_s4 + $0xe0] sm:$0xff] }
 0x227   : > { %v938_v0 = vunpack.c.l.b16 %v860_v60 }
 0x22c   : > { %v812_v61 = vpop.f32.mrf.mxu2 }
 0x22d   : > { %v861_v62 = vpack.c.bf16 %v812_v61, %v812_v61  ;;  %v3115_v61 = vld [vmem:[%s4120_s4 + $0x80] sm:$0xff] }
 0x22f   : > { %v939_v1 = vunpack.c.l.b16 %v861_v62 }
 0x231   : > { %v940_v2 = vpack.c.b16 %v939_v1, %v938_v0  ;;  %v3129_v0 = vld [vmem:[%s4120_s4 + $0xf0] sm:$0xff] }
 0x232   : > { %1312 = vmatpush.bf16.msrb.mxu1 %v3129_v0  ;;  %v3148_v0 = vld [vmem:[%s4121_s5 + $0x68] sm:$0xff] }
 0x233   : > { %941 = vrot.lane.b32.xlu1 %v940_v2, %s3333_s22  ;;  %v3128_v2 = vld [vmem:[%s4120_s4 + $0xe8] sm:$0xff] }
 0x234   : > { %v815_v9 = vpop.f32.mrf.mxu2 }
 0x235   : > { %v897_v11 = vpop.permute.xlu1 %896  ;;  %v862_v35 = vpack.c.bf16 %v815_v9, %v815_v9 }
 0x236   : > { %v984_v12 = vsel %vm982_vm2, %v981_v10, %v897_v11  ;;  %1313 = vmatpush.bf16.msrb.mxu1 %v3128_v2  ;;  %v3139_v2 = vld [vmem:[%s4121_s5 + $0x20] sm:$0xff] }
 0x237   : > { %1277 = vmatmul.bf16.vlgmr.msra.gmra.mxu3 %v984_v12  ;;  %v945_v15 = vunpack.c.l.b16 %v862_v35  ;;  %v3126_v12 = vld [vmem:[%s4120_s4 + $0xd8] sm:$0xff] }
 0x23a   : > { %1314 = vmatpush.bf16.msrb.mxu1 %v3127_v8  ;;  %v3147_v8 = vld [vmem:[%s4121_s5 + $0x60] sm:$0xff] }
 0x23c   : > { %v817_v36 = vpop.f32.mrf.mxu2 }
 0x23d   : > { %v863_v37 = vpack.c.bf16 %v817_v36, %v817_v36 }
 0x23e   : > { %1315 = vmatpush.bf16.msrb.mxu1 %v3126_v12  ;;  %v3137_v12 = vld [vmem:[%s4121_s5 + $0x10] sm:$0xff] }
 0x23f   : > { %v946_v16 = vunpack.c.l.b16 %v863_v37 }
 0x241   : > { %v947_v17 = vpack.c.b16 %v946_v16, %v945_v15 }
 0x242   : > { %1316 = vmatpush.bf16.msrb.mxu1 %v3125_v43  ;;  %v3136_v43 = vld [vmem:[%s4121_s5 + $0x8] sm:$0xff] }
 0x243   : > { %948 = vrot.lane.b32.xlu2 %v947_v17, %s3334_s25 }
 0x244   : > { %v820_v18 = vpop.f32.mrf.mxu2 }
 0x245   : > { %v864_v19 = vpack.c.bf16 %v820_v18, %v820_v18 }
 0x246   : > { %1317 = vmatpush.bf16.msrb.mxu1 %v3124_v44 }
 0x247   : > { %v3653_v22 = vunpack.c.l.b16 %v864_v19 }
 0x24c   : > { %v822_v20 = vpop.f32.mrf.mxu2 }
 0x24d   : > { %v865_v21 = vpack.c.bf16 %v822_v20, %v822_v20  ;;  %v916_v26 = vpop.permute.xlu2 %915  ;;  %v3265_v20 = vld [vmem:[%s4124_s8 + $0x1] ss:$0 sm:$0xff] }
 0x24f   : > { %v3655_v23 = vunpack.c.l.b16 %v865_v21 }
 0x251   : > { %v954_v24 = vpack.c.b16 %v3655_v23, %v3653_v22 }
 0x254   : > { %v825_v25 = vpop.f32.mrf.mxu2 }
 0x255   : > { %v909_v27 = vpop.permute.xlu1 %908  ;;  %v866_v29 = vpack.c.bf16 %v825_v25, %v825_v25 }
 0x256   : > { %v988_v28 = vsel %vm976_vm1, %v902_v5, %v909_v27  ;;  %v3121_v5 = vld [vmem:[%s4120_s4 + $0xb0] sm:$0xff] }
 0x257   : > { %v990_v33 = vsel %vm702_vm0, %v988_v28, %v916_v26  ;;  %v957_v38 = vunpack.c.l.b16 %v866_v29  ;;  %1298 = vmatpush.bf16.msrb.mxu0 %v3121_v5  ;;  %v1335_v5 = vld [vmem:[%s4118_s2 + $0x20] sm:$0xf] }
 0x25b   : > { %1299 = vmatpush.bf16.msrb.mxu0 %v3120_v41  ;;  %v1354_v41 = vunpack.c.l.b16 %v1335_v5 }
 0x25c   : > { %v827_v30 = vpop.f32.mrf.mxu2 }
 0x25d   : > { %v867_v31 = vpack.c.bf16 %v827_v30, %v827_v30  ;;  %v923_v32 = vpop.permute.xlu2 %922 }
 0x25e   : > { %v992_v34 = vsel %vm982_vm2, %v990_v33, %v923_v32 }
 0x25f   : > { %v958_v39 = vunpack.c.l.b16 %v867_v31  ;;  %1291 = vmatmul.bf16.vlgmr.msrb.gmra.mxu3 %v992_v34  ;;  %1300 = vmatpush.bf16.msrb.mxu0 %v3119_v48 }
 0x261   : > { %v959_v40 = vpack.c.b16 %v958_v39, %v957_v38  ;;  %v3131_v39 = vld [vmem:[%s4118_s2] sm:$0xff] }
 0x263   : > { %960 = vrot.lane.b32.xlu0 %v959_v40, %s3332_s21  ;;  %1301 = vmatpush.bf16.msrb.mxu0 %v3118_v53  ;;  %v3132_v40 = vld [vmem:[%s4118_s2 + $0x8] sm:$0xff]  ;;  %s3282_s21 = sshra.s32 %s2329_s28, 4  ;;  %s3283_s21 = int_to_ptr.hbm [resolvable:$true] %s3282_s21 }
 0x264   : > { %v830_v4 = vpop.f32.mrf.mxu2  ;;  %s3284_s14 = scalar_lea.hbm %s3283_s21, 1  ;;  %p3289_p0 = scmp.lt.s32.totalorder %s3283_s21, %s4125_s9 }
 0x265   : > { %v868_v42 = vpack.c.bf16 %v830_v4, %v830_v4  ;;  %v3134_v4 = vld [vmem:[%s4118_s2 + $0x18] sm:$0xff]  ;;  %p3285_p11 = scmp.ne.s32.totalorder %s3283_s21, %s3284_s14  ;;  %p3290_p1 = scmp.lt.s32.totalorder %s3288_s13, %s3284_s14 }
 0x267   : > { %v964_v49 = vunpack.c.l.b16 %v868_v42  ;;  %1302 = vmatpush.bf16.msrb.mxu0 %v3117_v54  ;;  %v1359_v42 = vpack.c.b16 %v1354_v41, %v1354_v41  ;;  %p3286_p12 = pnand %p3285_p11, %p3425_p5  ;;  %p3291_p2 = por %p3290_p1, %p3289_p0 }
 0x269   : > { %p3287_p13 = pneg %p3286_p12 }
 0x26b   : > { %1303 = vmatpush.bf16.msrb.mxu0 %v3116_v59  ;;  %v3170_v59 = vld [vmem:[%s4121_s5 + $0x118] sm:$0xff]  ;;  %p3292_p3 = pnand %p3291_p2, %p3287_p13 }
 0x26c   : > { %v832_v46 = vpop.f32.mrf.mxu2 }
 0x26d   : > { %v869_v47 = vpack.c.bf16 %v832_v46, %v832_v46 }
 0x26f   : > { %v965_v50 = vunpack.c.l.b16 %v869_v47  ;;  %1304 = vmatpush.bf16.msrb.mxu0 %v3115_v61  ;;  %v3149_v61 = vld [vmem:[%s4121_s5 + $0x70] sm:$0xff] }
 0x271   : > { %v966_v51 = vpack.c.b16 %v965_v50, %v964_v49 }
 0x273   : > { %967 = vrot.lane.b32.xlu1 %v966_v51, %s3333_s22 }
 0x274   : > { %v835_v52 = vpop.f32.mrf.mxu2 }
 0x275   : > { %v870_v55 = vpack.c.bf16 %v835_v52, %v835_v52 }
 0x277   : > { %v971_v57 = vunpack.c.l.b16 %v870_v55 }
 0x27c   : > { %v837_v56 = vpop.f32.mrf.mxu2 }
 0x27d   : > { %v871_v58 = vpack.c.bf16 %v837_v56, %v837_v56  ;;  %v3142_v56 = vld [vmem:[%s4121_s5 + $0x38] sm:$0xff] }
 0x27e   : > { %1748 = vmatpush.bf16.msra.mxu0 %v3142_v56 }
 0x27f   : > { %v972_v60 = vunpack.c.l.b16 %v871_v58  ;;  %v3141_v58 = vld [vmem:[%s4121_s5 + $0x30] sm:$0xff] }
 0x281   : > { %v973_v62 = vpack.c.b16 %v972_v60, %v971_v57  ;;  %v3150_v60 = vld [vmem:[%s4121_s5 + $0x78] sm:$0xff] }
 0x282   : > { %1749 = vmatpush.bf16.msra.mxu0 %v3141_v58  ;;  %v2918_v58 = vld [vmem:[%s4122_s6 + $0x68] sm:$0xf] }
 0x283   : > { %974 = vrot.lane.b32.xlu2 %v973_v62, %s3334_s25  ;;  %v3140_v62 = vld [vmem:[%s4121_s5 + $0x28] sm:$0xff]  ;;  %s326_s25 = sand.u32 1, %s3322_s10  }
 0x284   : > { %s327_s26 = scalar_lea.vmem [#allocation2], %s326_s25  ;;  %s2316_s29 = scalar_lea.sflag [#allocation3], %s326_s25 }
 0x285   : > { %s2326_s27 = sshll.u32 %s327_s26, 4  ;;  %s2327_s27 = int_to_ptr.vmem [resolvable:$true] %s2326_s27 }
 0x286   : > { %1750 = vmatpush.bf16.msra.mxu0 %v3140_v62  ;;  %v2894_v62 = vld [vmem:[%s4122_s6 + $0x40] sm:$0xf] }
 0x28a   : > { %1751 = vmatpush.bf16.msra.mxu0 %v3139_v2  ;;  %v2896_v2 = vld [vmem:[%s4122_s6 + $0x50] sm:$0xf0] }
 0x295   : > { %v935_v1 = vpop.permute.xlu0 %934 }
 0x296   : > { %v996_v6 = vsel %vm976_vm1, %v928_v45, %v935_v1  ;;  %v3123_v45 = vld [vmem:[%s4120_s4 + $0xc0] sm:$0xff] }
 0x297   : > { %1318 = vmatpush.bf16.msrb.mxu1 %v3123_v45 }
 0x29b   : > { %1761 = vmatpush.bf16.msra.mxu1 %v3150_v60 }
 0x29d   : > { %v949_v9 = vpop.permute.xlu2 %948 }
 0x29f   : > { %1762 = vmatpush.bf16.msra.mxu1 %v3149_v61 }
 0x2a3   : > { %1763 = vmatpush.bf16.msra.mxu1 %v3148_v0  ;;  %v3179_v0 = vld [vmem:[%s4122_s6 + $0x44] sm:$0xf] }
 0x2a5   : > { %v942_v7 = vpop.permute.xlu1 %941 }
 0x2a6   : > { %v998_v10 = vsel %vm702_vm0, %v996_v6, %v942_v7  ;;  %v3169_v6 = vld [vmem:[%s4121_s5 + $0x110] sm:$0xff] }
 0x2a7   : > { %v1000_v11 = vsel %vm982_vm2, %v998_v10, %v949_v9  ;;  %v3138_v10 = vld [vmem:[%s4121_s5 + $0x18] sm:$0xff]  ;;  %1764 = vmatpush.bf16.msra.mxu1 %v3147_v8  ;;  %v2899_v8 = vor.u32 %v3179_v0, %v2896_v2  ;;  %v3209_v2 = vld [vmem:[%s4123_s7 + $0xb0] sm:$0xff] }
 0x2a8   : > { %1305 = vmatmul.bf16.vlgmr.msrb.gmra.mxu0 %v1000_v11 }
 0x2a9   : > { %1752 = vmatpush.bf16.msra.mxu0 %v3138_v10 }
 0x2ad   : > { %1753 = vmatpush.bf16.msra.mxu0 %v3137_v12 }
 0x2b1   : > { %1754 = vmatpush.bf16.msra.mxu0 %v3136_v43  ;;  %v2878_v43 = vld [vmem:[%s4122_s6 + $0x20] sm:$0xf] }
 0x2ba   : > { %v1278_v16 = vpop.f32.mrf.mxu3 }
 0x2bb   : > { %v1279_v25 = vadd.f32 %v3265_v20, %v1278_v16  ;;  %v3155_v16 = vld [vmem:[%s4121_s5 + $0xa0] sm:$0xff] }
 0x2c2   : > { %v1280_v17 = vpop.f32.mrf.mxu3 }
 0x2c3   : > { %v1281_v23 = vadd.f32 %v3265_v20, %v1280_v17  ;;  %v3146_v17 = vld [vmem:[%s4121_s5 + $0x58] sm:$0xff]  ;;  %v3153_v20 = vld [vmem:[%s4121_s5 + $0x90] sm:$0xff] }
 0x2c4   : > { %1765 = vmatpush.bf16.msra.mxu1 %v3146_v17 }
 0x2d5   : > { %v961_v13 = vpop.permute.xlu0 %960 }
 0x2d6   : > { %v1004_v14 = vsel %vm976_vm1, %v954_v24, %v961_v13  ;;  %v3135_v13 = vld [vmem:[%s4121_s5] sm:$0xff] }
 0x2d7   : > { %1755 = vmatpush.bf16.msra.mxu0 %v3135_v13 }
 0x2dd   : > { %v975_v36 = vpop.permute.xlu2 %974 }
 0x2e2   : > { %v1292_v18 = vpop.f32.mrf.mxu3 }
 0x2e3   : > { %v1293_v24 = vadd.f32 %v1292_v18, %v1279_v25  ;;  %v3154_v18 = vld [vmem:[%s4121_s5 + $0x98] sm:$0xff]  ;;  %v3152_v25 = vld [vmem:[%s4121_s5 + $0x88] sm:$0xff] }
 0x2e5   : > { %v968_v35 = vpop.permute.xlu1 %967 }
 0x2e6   : > { %v1006_v37 = vsel %vm702_vm0, %v1004_v14, %v968_v35  ;;  %v3158_v14 = vld [vmem:[%s4121_s5 + $0xb8] sm:$0xff] }
 0x2e7   : > { %v1008_v15 = vsel %vm982_vm2, %v1006_v37, %v975_v36  ;;  %1774 = vmatpush.bf16.msrb.mxu0 %v3158_v14  ;;  %v3157_v37 = vld [vmem:[%s4121_s5 + $0xb0] sm:$0xff] }
 0x2e8   : > { %1319 = vmatmul.bf16.vlgmr.msrb.gmra.mxu1 %v1008_v15  ;;  %v3156_v15 = vld [vmem:[%s4121_s5 + $0xa8] sm:$0xff] }
 0x2ea   : > { %v1294_v22 = vpop.f32.mrf.mxu3 }
 0x2eb   : > { %v1295_v27 = vadd.f32 %v1294_v22, %v1281_v23  ;;  %1775 = vmatpush.bf16.msrb.mxu0 %v3157_v37  ;;  %v3143_v22 = vld [vmem:[%s4121_s5 + $0x40] sm:$0xff]  ;;  %v2886_v37 = vld [vmem:[%s4122_s6 + $0x28] sm:$0xf] }
 0x2ec   : > { %v3151_v23 = vld [vmem:[%s4121_s5 + $0x80] sm:$0xff] }
 0x2ef   : > { %1776 = vmatpush.bf16.msrb.mxu0 %v3156_v15  ;;  %v3178_v15 = vld [vmem:[%s4122_s6 + $0x34] sm:$0xf0] }
 0x2f0   : > { %v2887_v17 = vor.u32 %v3178_v15, %v2886_v37  ;;  %v3204_v37 = vld [vmem:[%s4123_s7 + $0x88] sm:$0xff]  ;;  %v3214_v15 = vld [vmem:[%s4123_s7 + $0xd8] sm:$0xff] }
 0x2f3   : > { %1777 = vmatpush.bf16.msrb.mxu0 %v3155_v16 }
 0x2f7   : > { %1778 = vmatpush.bf16.msrb.mxu0 %v3154_v18 }
 0x2fb   : > { %1779 = vmatpush.bf16.msrb.mxu0 %v3153_v20  ;;  %v3173_v20 = vld [vmem:[%s4122_s6 + $0xc] sm:$0xf0] }
 0x2ff   : > { %1780 = vmatpush.bf16.msrb.mxu0 %v3152_v25 }
 0x303   : > { %1781 = vmatpush.bf16.msrb.mxu0 %v3151_v23  ;;  %v2870_v23 = vld [vmem:[%s4122_s6 + $0x8] sm:$0xf] }
 0x325   : > { %v1306_v19 = vpop.f32.mrf.mxu0 }
 0x326   : > { %v1307_v28 = vadd.f32 %v1306_v19, %v1293_v24  ;;  %v3145_v19 = vld [vmem:[%s4121_s5 + $0x50] sm:$0xff]  ;;  %v3166_v24 = vld [vmem:[%s4121_s5 + $0xf8] sm:$0xff] }
 0x327   : > { %1766 = vmatpush.bf16.msra.mxu1 %v3145_v19  ;;  %v2862_v19 = vld [vmem:[%s4122_s6] sm:$0xf] }
 0x328   : > { %v2863_v25 = vor.u32 %v3173_v20, %v2862_v19  ;;  %v3211_v19 = vld [vmem:[%s4123_s7 + $0xc0] sm:$0xff] }
 0x329   : > { %v339_v20 = vld [vmem:[%s4124_s8 + $0x3] sm:$0xf] }
 0x32d   : > { %v1308_v26 = vpop.f32.mrf.mxu0 }
 0x32e   : > { %v1309_v29 = vadd.f32 %v1308_v26, %v1295_v27  ;;  %v3168_v26 = vld [vmem:[%s4121_s5 + $0x108] sm:$0xff]  ;;  %v3165_v27 = vld [vmem:[%s4121_s5 + $0xf0] sm:$0xff] }
 0x365   : > { %v1320_v21 = vpop.f32.mrf.mxu1 }
 0x366   : > { %v1321_v30 = vadd.f32 %v1320_v21, %v1307_v28  ;;  %v3144_v21 = vld [vmem:[%s4121_s5 + $0x48] sm:$0xff]  ;;  %v3167_v28 = vld [vmem:[%s4121_s5 + $0x100] sm:$0xff] }
 0x367   : > { %1767 = vmatpush.bf16.msra.mxu1 %v3144_v21  ;;  %v3171_v21 = vld [vmem:[%s4122_s6 + $0x4] sm:$0xf] }
 0x368   : > { %v1325_v33 = vmax.f32 %v1321_v30, 0.0  ;;  %v3163_v30 = vld [vmem:[%s4121_s5 + $0xe0] sm:$0xff] }
 0x36b   : > { %1768 = vmatpush.bf16.msra.mxu1 %v3143_v22  ;;  %v2864_v22 = vld [vmem:[%s4122_s6 + $0x10] sm:$0xf0] }
 0x36d   : > { %v1322_v31 = vpop.f32.mrf.mxu1 }
 0x36e   : > { %v1323_v32 = vadd.f32 %v1322_v31, %v1309_v29  ;;  %v3164_v29 = vld [vmem:[%s4121_s5 + $0xe8] sm:$0xff] }
 0x36f   : > { %1787 = vmatpush.bf16.msrb.mxu1 %v3166_v24  ;;  %v3174_v24 = vld [vmem:[%s4122_s6 + $0x14] sm:$0xf0] }
 0x370   : > { %v1326_v34 = vmax.f32 %v1323_v32, 0.0  ;;  %v3162_v32 = vld [vmem:[%s4121_s5 + $0xd8] sm:$0xff] }
 0x372   : > { %v1336_v38 = vpack.c.bf16 %v1326_v34, %v1325_v33 }
 0x373   : > { %1788 = vmatpush.bf16.msrb.mxu1 %v3165_v27  ;;  %v2871_v27 = vor.u32 %v3174_v24, %v2870_v23 }
 0x374   : > { %1383 = vmatpush.bf16.msra.mxu3 %v1336_v38  ;;  %v3161_v38 = vld [vmem:[%s4121_s5 + $0xd0] sm:$0xff] }
 0x377   : > { %2710 = vmatmul.msk.bf16.vlgmr.msra.gmra.mxu3 %vm1360_vm3, %v3131_v39  ;;  %1789 = vmatpush.bf16.msrb.mxu1 %v3164_v29 }
 0x378   : > { %1804 = vmatpush.bf16.msrb.mxu3 %v3170_v59  ;;  %v3186_v59 = vld [vmem:[%s4122_s6 + $0x74] sm:$0xf0] }
 0x379   : > { %v2919_v61 = vor.u32 %v3186_v59, %v2918_v58  ;;  %v3191_v58 = vld [vmem:[%s4123_s7 + $0x20] sm:$0xff] }
 0x37a   : > { %v3199_v59 = vld [vmem:[%s4123_s7 + $0x60] sm:$0xff] }
 0x37b   : > { %1790 = vmatpush.bf16.msrb.mxu1 %v3163_v30  ;;  %v3184_v30 = vld [vmem:[%s4122_s6 + $0x6c] sm:$0xf] }
 0x37c   : > { %1805 = vmatpush.bf16.msrb.mxu3 %v3169_v6  ;;  %v2902_v6 = vld [vmem:[%s4122_s6 + $0x48] sm:$0xf] }
 0x37f   : > { %1791 = vmatpush.bf16.msrb.mxu1 %v3162_v32 }
 0x380   : > { %1806 = vmatpush.bf16.msrb.mxu3 %v3168_v26  ;;  %v2867_v26 = vor.u32 %v3171_v21, %v2864_v22  ;;  %v1832_v21 = vperm.slane %v339_v20, 0 }
 0x383   : > { %1792 = vmatpush.bf16.msrb.mxu1 %v3161_v38 }
 0x384   : > { %1807 = vmatpush.bf16.msrb.mxu3 %v3167_v28 }
 0x387   : > { %2711 = vmatmul.msk.bf16.gmra.mxu3 %vm1360_vm3, %v3132_v40 }
 0x388   : > { %1953 = vmatpush.bf16.msra.mxu3 %v2919_v61  ;;  %v3210_v61 = vld [vmem:[%s4123_s7 + $0xb8] sm:$0xff] }
 0x397   : > { %2712 = vmatmul.msk.bf16.gmra.mxu3 %vm1360_vm3, %v3133_v3  ;;  %v3160_v3 = vld [vmem:[%s4121_s5 + $0xc8] sm:$0xff] }
 0x398   : > { %1793 = vmatpush.bf16.msrb.mxu1 %v3160_v3 }
 0x3a7   : > { %2713 = vmatmul.msk.bf16.gmra.mxu3 %vm1360_vm3, %v3134_v4  ;;  %v3159_v4 = vld [vmem:[%s4121_s5 + $0xc0] sm:$0xff] }
 0x3a8   : > { %1794 = vmatpush.bf16.msrb.mxu1 %v3159_v4  ;;  %v3172_v4 = vld [vmem:[%s4122_s6 + $0xc] sm:$0xf] }
 0x3b7   : > { %2714 = vmatmul.msk.bf16.gmra.mxu3 %vm1360_vm3, %v1359_v42 }
 0x3fa   : > { %v3746_v46 = vpop.f32.mrf.mxu3 }
 0x3fb   : > { %v1409_v31 = vpack.c.bf16 %v3746_v46, %v3746_v46 }
 0x402   : > { %v1387_v47 = vpop.f32.mrf.mxu3 }
 0x403   : > { %v1410_v48 = vpack.c.bf16 %v1387_v47, %v1387_v47 }
 0x405   : > { %v1419_v49 = vunpack.c.l.b16 %v1410_v48 }
 0x407   : > { %v1420_v50 = vpack.c.b16 %v1419_v49, %v1419_v49 }
 0x409   : > { %1421 = vrot.lane.b32.xlu0 %v1420_v50, %s3333_s22 }
 0x40a   : > { %v3749_v51 = vpop.f32.mrf.mxu3 }
 0x40b   : > { %v1411_v42 = vpack.c.bf16 %v3749_v51, %v3749_v51  ;;  %v2910_v51 = vld [vmem:[%s4122_s6 + $0x60] sm:$0xf] }
 0x412   : > { %v1392_v52 = vpop.f32.mrf.mxu3 }
 0x413   : > { %v1412_v53 = vpack.c.bf16 %v1392_v52, %v1392_v52 }
 0x415   : > { %v1424_v54 = vunpack.c.l.b16 %v1412_v53 }
 0x417   : > { %v1425_v55 = vpack.c.b16 %v1424_v54, %v1424_v54  ;;  %v3185_v54 = vld [vmem:[%s4122_s6 + $0x6c] sm:$0xf0] }
 0x418   : > { %v2911_v56 = vor.u32 %v3185_v54, %v2910_v51  ;;  %v3192_v51 = vld [vmem:[%s4123_s7 + $0x28] sm:$0xff] }
 0x419   : > { %1426 = vrot.lane.b32.xlu1 %v1425_v55, %s3333_s22  ;;  %v3183_v55 = vld [vmem:[%s4122_s6 + $0x64] sm:$0xf] }
 0x41a   : > { %v3755_v57 = vpop.f32.mrf.mxu3 }
 0x41b   : > { %v1413_v46 = vpack.c.bf16 %v3755_v57, %v3755_v57  ;;  %v2912_v57 = vld [vmem:[%s4122_s6 + $0x70] sm:$0xf0] }
 0x41c   : > { %v2915_v60 = vor.u32 %v3183_v55, %v2912_v57  ;;  %v3200_v55 = vld [vmem:[%s4123_s7 + $0x68] sm:$0xff] }
 0x422   : > { %v1397_v63 = vpop.f32.mrf.mxu3 }
 0x423   : > { %v1414_v1 = vpack.c.bf16 %v1397_v63, %v1397_v63  ;;  %v3181_v63 = vld [vmem:[%s4122_s6 + $0x4c] sm:$0xf0] }
 0x425   : > { %v1429_v7 = vunpack.c.l.b16 %v1414_v1  ;;  %v2895_v1 = vor.u32 %v3181_v63, %v2894_v62  ;;  %v3190_v63 = vld [vmem:[%s4123_s7 + $0x18] sm:$0xff] }
 0x427   : > { %v1430_v9 = vpack.c.b16 %v1429_v7, %v1429_v7  ;;  %v3182_v7 = vld [vmem:[%s4122_s6 + $0x54] sm:$0xf0] }
 0x429   : > { %1431 = vrot.lane.b32.xlu2 %v1430_v9, %s3333_s22  ;;  %v2903_v9 = vor.u32 %v3182_v7, %v2902_v6  ;;  %v3189_v6 = vld [vmem:[%s4123_s7 + $0x10] sm:$0xff] }
 0x42a   : > { %v3788_v11 = vpop.f32.mrf.mxu3  ;;  %v3197_v7 = vld [vmem:[%s4123_s7 + $0x50] sm:$0xff] }
 0x42b   : > { %v1415_v50 = vpack.c.bf16 %v3788_v11, %v3788_v11  ;;  %1954 = vmatpush.bf16.msra.mxu3 %v2903_v9  ;;  %v3188_v9 = vld [vmem:[%s4123_s7 + $0x8] sm:$0xff] }
 0x42f   : > { %1955 = vmatpush.bf16.msra.mxu3 %v2887_v17  ;;  %v3213_v17 = vld [vmem:[%s4123_s7 + $0xd0] sm:$0xff] }
 0x432   : > { %v1402_v44 = vpop.f32.mrf.mxu3 }
 0x433   : > { %v1416_v45 = vpack.c.bf16 %v1402_v44, %v1402_v44  ;;  %v3177_v44 = vld [vmem:[%s4122_s6 + $0x2c] sm:$0xf0]  ;;  %1956 = vmatpush.bf16.msra.mxu3 %v2871_v27 }
 0x435   : > { %v1434_v35 = vunpack.c.l.b16 %v1416_v45  ;;  %v3175_v45 = vld [vmem:[%s4122_s6 + $0x24] sm:$0xf] }
 0x437   : > { %v1435_v36 = vpack.c.b16 %v1434_v35, %v1434_v35  ;;  %v2879_v35 = vor.u32 %v3177_v44, %v2878_v43  ;;  %v3206_v43 = vld [vmem:[%s4123_s7 + $0x98] sm:$0xff]  ;;  %v3217_v44 = vld [vmem:[%s4123_s7 + $0xf0] sm:$0xff] }
 0x439   : > { %1436 = vrot.lane.b32.xlu0 %v1435_v36, %s3333_s22  ;;  %v2880_v36 = vld [vmem:[%s4122_s6 + $0x30] sm:$0xf0] }
 0x43a   : > { %v1405_v39 = vpop.f32.mrf.mxu3  ;;  %v2883_v16 = vor.u32 %v3175_v45, %v2880_v36  ;;  %v3196_v45 = vld [vmem:[%s4123_s7 + $0x48] sm:$0xff]  ;;  %v3215_v36 = vld [vmem:[%s4123_s7 + $0xe0] sm:$0xff] }
 0x43b   : > { %v1417_v40 = vpack.c.bf16 %v1405_v39, %v1405_v39  ;;  %v3176_v39 = vld [vmem:[%s4122_s6 + $0x2c] sm:$0xf] }
 0x43d   : > { %2859 = vmatmul.msk.bf16.vlgmr.msrb.gmra.mxu3 %vm702_vm0, %v1417_v40  ;;  %v2888_v40 = vld [vmem:[%s4122_s6 + $0x38] sm:$0xf0] }
 0x43e   : > { %v2891_v3 = vor.u32 %v3176_v39, %v2888_v40 }
 0x442   : > { %v1407_v5 = vpop.f32.mrf.mxu3 }
 0x443   : > { %v2872_v5 = vld [vmem:[%s4122_s6 + $0x18] sm:$0xf0] }
 0x47b   : > { %v1422_v33 = vpop.permute.xlu0 %1421 }
 0x47c   : > { %v1440_v34 = vsel %vm702_vm0, %v1409_v31, %v1422_v33  ;;  %v2920_v31 = vld [vmem:[%s4122_s6 + $0x78] sm:$0xf0]  ;;  %v3180_v33 = vld [vmem:[%s4122_s6 + $0x4c] sm:$0xf] }
 0x47d   : > { %1756 = vmatmul.bf16.vlgmr.msra.gmra.mxu0 %v1440_v34  ;;  %v2923_v32 = vor.u32 %v3184_v30, %v2920_v31  ;;  %v2904_v34 = vld [vmem:[%s4122_s6 + $0x58] sm:$0xf0] }
 0x47e   : > { %1927 = vmatpush.bf16.msra.mxu0 %v2911_v56  ;;  %v2907_v38 = vor.u32 %v3180_v33, %v2904_v34 }
 0x482   : > { %1928 = vmatpush.bf16.msra.mxu0 %v2895_v1  ;;  %v3198_v1 = vld [vmem:[%s4123_s7 + $0x58] sm:$0xff] }
 0x483   : > { %v1432_v41 = vpop.permute.xlu2 %1431 }
 0x484   : > { %v1448_v48 = vsel %vm702_vm0, %v1413_v46, %v1432_v41  ;;  %v2875_v41 = vor.u32 %v3172_v4, %v2872_v5 }
 0x486   : > { %1929 = vmatpush.bf16.msra.mxu0 %v2879_v35  ;;  %v3195_v35 = vld [vmem:[%s4123_s7 + $0x40] sm:$0xff] }
 0x48a   : > { %1930 = vmatpush.bf16.msra.mxu0 %v2863_v25  ;;  %v1833_v25 = vperm.slane %v339_v20, 1 }
 0x48b   : > { %v1427_v47 = vpop.permute.xlu1 %1426 }
 0x48c   : > { %v1444_v49 = vsel %vm702_vm0, %v1411_v42, %v1427_v47  ;;  %v3266_v42 = vld [vmem:[%s4124_s8 + $0x2] ss:$0 sm:$0xff]  ;;  %v3194_v47 = vld [vmem:[%s4123_s7 + $0x38] sm:$0xff] }
 0x48d   : > { %1769 = vmatmul.bf16.vlgmr.msra.gmra.mxu1 %v1444_v49  ;;  %1782 = vmatmul.bf16.vlgmr.msrb.gmra.mxu0 %v1448_v48  ;;  %v3202_v48 = vld [vmem:[%s4123_s7 + $0x78] sm:$0xff] }
 0x48e   : > { %1940 = vmatpush.bf16.msra.mxu1 %v2915_v60  ;;  %1966 = vmatpush.bf16.msrb.mxu0 %v2923_v32 }
 0x48f   : > { %2255 = vmatpush.bf16.msrb.mxu3 %v3202_v48  ;;  %v3335_v48 = vmov 0  }
 0x490   : > { %3263 = vset.pattern.permute.xlu0 %v3335_v48 }
 0x492   : > { %1941 = vmatpush.bf16.msra.mxu1 %v2899_v8  ;;  %1967 = vmatpush.bf16.msrb.mxu0 %v2907_v38  ;;  %v3208_v8 = vld [vmem:[%s4123_s7 + $0xa8] sm:$0xff] }
 0x496   : > { %1942 = vmatpush.bf16.msra.mxu1 %v2883_v16  ;;  %1968 = vmatpush.bf16.msrb.mxu0 %v2891_v3  ;;  %v3203_v16 = vld [vmem:[%s4123_s7 + $0x80] sm:$0xff]  ;;  %v1835_v3 = vperm.slane %v339_v20, 3 }
 0x49a   : > { %1943 = vmatpush.bf16.msra.mxu1 %v2867_v26  ;;  %1969 = vmatpush.bf16.msrb.mxu0 %v2875_v41 }
 0x4ab   : > { %v1437_v52 = vpop.permute.xlu0 %1436 }
 0x4ac   : > { %v1452_v53 = vsel %vm702_vm0, %v1415_v50, %v1437_v52  ;;  %v3193_v50 = vld [vmem:[%s4123_s7 + $0x30] sm:$0xff] }
 0x4ad   : > { %1795 = vmatmul.bf16.vlgmr.msrb.gmra.mxu1 %v1452_v53  ;;  %v3201_v52 = vld [vmem:[%s4123_s7 + $0x70] sm:$0xff] }
 0x4ae   : > { %2242 = vmatpush.bf16.msrb.mxu1 %v3194_v47  ;;  %2256 = vmatpush.bf16.msrb.mxu3 %v3201_v52 }
 0x4b2   : > { %2243 = vmatpush.bf16.msrb.mxu1 %v3193_v50  ;;  %2257 = vmatpush.bf16.msrb.mxu3 %v3200_v55  ;;  %v3267_v50 = vld [vmem:[%s4124_s8 + $0x7] ss:$0 sm:$0xff] }
 0x4b6   : > { %2244 = vmatpush.bf16.msrb.mxu1 %v3192_v51  ;;  %2258 = vmatpush.bf16.msrb.mxu3 %v3199_v59 }
 0x4ba   : > { %2245 = vmatpush.bf16.msrb.mxu1 %v3191_v58  ;;  %2259 = vmatpush.bf16.msrb.mxu3 %v3198_v1 }
 0x4be   : > { %2246 = vmatpush.bf16.msrb.mxu1 %v3190_v63  ;;  %2260 = vmatpush.bf16.msrb.mxu3 %v3197_v7 }
 0x4c0   : > { %v1809_v12 = vpop.f32.mrf.mxu3 }
 0x4c2   : > { %2247 = vmatpush.bf16.msrb.mxu1 %v3189_v6  ;;  %2261 = vmatpush.bf16.msrb.mxu3 %v3196_v45 }
 0x4c6   : > { %2248 = vmatpush.bf16.msrb.mxu1 %v3188_v9  ;;  %2262 = vmatpush.bf16.msrb.mxu3 %v3195_v35 }
 0x4c8   : > { %v1811_v18 = vpop.f32.mrf.mxu3 }
 0x4c9   : > { %v3212_v18 = vld [vmem:[%s4123_s7 + $0xc8] sm:$0xff] }
 0x4fa   : > { %v1757_v10 = vpop.f32.mrf.mxu0 }
 0x4fb   : > { %v1758_v46 = vadd.f32 %v3266_v42, %v1757_v10  ;;  %v3207_v10 = vld [vmem:[%s4123_s7 + $0xa0] sm:$0xff] }
 0x502   : > { %v1759_v11 = vpop.f32.mrf.mxu0 }
 0x503   : > { %v3187_v11 = vld [vmem:[%s4123_s7] sm:$0xff] }
 0x504   : > { %2249 = vmatpush.bf16.msrb.mxu1 %v3187_v11 }
 0x50a   : > { %v1770_v13 = vpop.f32.mrf.mxu1  ;;  %v1783_v14 = vpop.f32.mrf.mxu0 }
 0x50b   : > { %v1771_v49 = vadd.f32 %v1770_v13, %v1758_v46  ;;  %v3216_v13 = vld [vmem:[%s4123_s7 + $0xe8] sm:$0xff] }
 0x50d   : > { %v1784_v53 = vadd.f32 %v1783_v14, %v1771_v49  ;;  %v3205_v14 = vld [vmem:[%s4123_s7 + $0x90] sm:$0xff] }
 0x512   : > { %v1772_v28 = vpop.f32.mrf.mxu1  ;;  %v1785_v29 = vpop.f32.mrf.mxu0 }
 0x513   : > { %v1834_v29 = vperm.slane %v339_v20, 2 }
 0x52a   : > { %v1796_v54 = vpop.f32.mrf.mxu1 }
 0x52b   : > { %v1797_v56 = vadd.f32 %v1796_v54, %v1784_v53 }
 0x52d   : > { %v1810_v57 = vadd.f32 %v1809_v12, %v1797_v56  ;;  %v3218_v12 = vld [vmem:[%s4123_s7 + $0xf8] sm:$0xff] }
 0x52f   : > { %v1813_v60 = vmax.f32 %v1810_v57, 0.0 }
 0x531   : > { %v1814_v62 = vpack.c.bf16 %v1813_v60, %v1813_v60 }
 0x532   : > { %v1798_v0 = vpop.f32.mrf.mxu1 }
 0x533   : > { %2924 = vmatmul.msk.bf16.vlgmr.msra.gmra.mxu0 %vm702_vm0, %v1814_v62  ;;  %2925 = vmatmul.msk.bf16.vlgmr.msra.gmra.mxu1 %vm702_vm0, %v1814_v62 }
 0x534   : > { %2926 = vmatmul.msk.bf16.vlgmr.msra.gmra.mxu3 %vm702_vm0, %v1814_v62  ;;  %2268 = vmatpush.bf16.msra.mxu0 %v3210_v61 }
 0x535   : > { %2281 = vmatpush.bf16.msra.mxu1 %v3218_v12 }
 0x538   : > { %2269 = vmatpush.bf16.msra.mxu0 %v3209_v2 }
 0x539   : > { %2282 = vmatpush.bf16.msra.mxu1 %v3217_v44 }
 0x53c   : > { %2270 = vmatpush.bf16.msra.mxu0 %v3208_v8 }
 0x53d   : > { %2283 = vmatpush.bf16.msra.mxu1 %v3216_v13 }
 0x540   : > { %2271 = vmatpush.bf16.msra.mxu0 %v3207_v10 }
 0x541   : > { %2284 = vmatpush.bf16.msra.mxu1 %v3215_v36 }
 0x543   : > { %2927 = vmatmul.msk.bf16.vlgmr.msrb.gmra.mxu0 %vm702_vm0, %v1814_v62 }
 0x544   : > { %2272 = vmatpush.bf16.msra.mxu0 %v3206_v43 }
 0x545   : > { %2285 = vmatpush.bf16.msra.mxu1 %v3214_v15 }
 0x548   : > { %2273 = vmatpush.bf16.msra.mxu0 %v3205_v14 }
 0x549   : > { %2286 = vmatpush.bf16.msra.mxu1 %v3213_v17 }
 0x54c   : > { %2274 = vmatpush.bf16.msra.mxu0 %v3204_v37 }
 0x54d   : > { %2287 = vmatpush.bf16.msra.mxu1 %v3212_v18 }
 0x550   : > { %2275 = vmatpush.bf16.msra.mxu0 %v3203_v16 }
 0x551   : > { %2288 = vmatpush.bf16.msra.mxu1 %v3211_v19 }
 0x5b0   : > { %v1932_v22 = vpop.f32.mrf.mxu0  ;;  %v1945_v23 = vpop.f32.mrf.mxu1 }
 0x5b1   : > { %v1933_v24 = vadd.f32 %v1932_v22, %v1832_v21  ;;  %v1946_v26 = vadd.f32 %v1945_v23, %v1833_v25 }
 0x5b3   : > { %v1975_v27 = vmax.f32 %v1933_v24, 0.0  ;;  %v1976_v28 = vmax.f32 %v1946_v26, 0.0 }
 0x5b5   : > { %v1979_v30 = vpack.c.bf16 %v1975_v27, %v1975_v27  ;;  %v1980_v31 = vpack.c.bf16 %v1976_v28, %v1976_v28 }
 0x5b7   : > { %v1958_v32 = vpop.f32.mrf.mxu3  ;;  %2250 = vmatmul.bf16.vlgmr.msrb.gmra.mxu1 %v1979_v30  ;;  %2263 = vmatmul.bf16.vlgmr.msrb.gmra.mxu3 %v1980_v31 }
 0x5b8   : > { %v1959_v33 = vadd.f32 %v1958_v32, %v1834_v29  ;;  %v1934_v34 = vpop.f32.mrf.mxu0  ;;  %v1947_v38 = vpop.f32.mrf.mxu1 }
 0x5ba   : > { %v1977_v39 = vmax.f32 %v1959_v33, 0.0 }
 0x5bc   : > { %v1981_v40 = vpack.c.bf16 %v1977_v39, %v1977_v39 }
 0x5be   : > { %2276 = vmatmul.bf16.vlgmr.msra.gmra.mxu0 %v1981_v40 }
 0x5bf   : > { %v1960_v4 = vpop.f32.mrf.mxu3 }
 0x5c0   : > { %v1971_v5 = vpop.f32.mrf.mxu0 }
 0x5c1   : > { %v1972_v41 = vadd.f32 %v1971_v5, %v1835_v3 }
 0x5c3   : > { %v1978_v42 = vmax.f32 %v1972_v41, 0.0 }
 0x5c5   : > { %v1982_v46 = vpack.c.bf16 %v1978_v42, %v1978_v42 }
 0x5c7   : > { %2289 = vmatmul.bf16.vlgmr.msra.gmra.mxu1 %v1982_v46 }
 0x5c8   : > { %v1973_v47 = vpop.f32.mrf.mxu0 }
 0x634   : > { %v2251_v49 = vpop.f32.mrf.mxu1 }
 0x635   : > { %v2252_v54 = vadd.f32 %v3267_v50, %v2251_v49 }
 0x63a   : > { %v2264_v52 = vpop.f32.mrf.mxu3 }
 0x63b   : > { %v2277_v53 = vpop.f32.mrf.mxu0  ;;  %v2265_v55 = vadd.f32 %v2264_v52, %v2252_v54 }
 0x63c   : > { %v2253_v51 = vpop.f32.mrf.mxu1 }
 0x63d   : > { %v2278_v57 = vadd.f32 %v2277_v53, %v2265_v55 }
 0x642   : > { %v2266_v56 = vpop.f32.mrf.mxu3 }
 0x643   : > { %v2279_v58 = vpop.f32.mrf.mxu0 }
 0x644   : > { %v2290_v59 = vpop.f32.mrf.mxu1 }
 0x645   : > { %v2291_v60 = vadd.f32 %v2290_v59, %v2278_v57 }
 0x647   : > { %2305 = vperm.xlu0 %3263, %v2291_v60   ;;  %2295 = vrot.lane.b32.xlu1 %v2291_v60, %s3336_s18 }
 0x64c   : > { %v2292_v61 = vpop.f32.mrf.mxu1 }
 0x6b9   : > { %v2296_v62 = vpop.permute.xlu1 %2295  ;;  %v2306_v6 = vpop.permute.xlu0 %2305 }
 0x6ba   : > { %v2299_v63 = vsel %vm2298_vm4, %v2296_v62, 0.0 }
 0x6bb   : > { %2300 = vadd.xlane.f32.xlu2 %v2299_v63 }
 0x72e   : > { %v2301_v0 = vpop.xlane.xlu2 %2300 }
 0x72f   : > { %v2302_v1 = vmul.f32 0.16666667, %v2301_v0 }
 0x731   : > { %v2303_v2 = vsub.f32 %v2291_v60, %v2302_v1 }
 0x733   : > { %v2308_v7 = vadd.f32 %v2306_v6, %v2303_v2 }
 0x735   : > { %2310 = vrot.lane.b32.xlu1 %v2308_v7, %s3336_s18 }
 0x7a7   : > { %v2311_v8 = vpop.permute.xlu1 %2310 }
 0x7a8   : > { %2314 = vst.msk [vmem:[%s327_s26] sm:$0x1] %vm2313_vm5, %v2311_v8 }
 0x7a9   : > { %3295 = shalt.err (!%p3292_p3)
}
 0x7aa   : > { %3219 = dma.vmem_to_hbm [thread:$0]  (%p3425_p5), %s2327_s27, 16, %s2329_s28, %s2316_s29  }
 0x7ab PF: > { %p3225_p4 = scmp.ge.s32.totalorder %s3330_s12, 2  ;;  %s2340_s25 = sand.u32 1, %s3318_s30  }
 0x7ac   : > { %s2341_s22 = scalar_lea.sflag [#allocation3], %s2340_s25 }
 0x7ad   : > { %p3222_p7 = pnand %p3225_p4, %p3429_p6 }
 0x7af   : > { %p3223_p8 = pneg %p3222_p7 }
 0x7b1   : > { %3313 = dma.done.wait (%p3223_p8), %s2341_s22, 16  }
 0x7b2   : > { %3315 = vsyncadd (%p3223_p8), %s2341_s22, 4294967280  ;;  %s4129_s24 = sld [smem:[#allocation5_spill]]  ;;  %p19_p9 = scmp.ge.s32.totalorder %s3412_s15, 4  }
 0x7b3   : > { %s4130_s30 = smov %s3322_s10  ;;  %s4131_s10 = smov %s3326_s11 }
 0x7b4   : > { %s4133_s12 = smov %s3412_s15  ;;  %21 = sbr.rel (!%p19_p9) target bundleno = 3 (0x3), region = 91 }
 0x7b8   : > { %s4132_s11 = smov %s4129_s24 }
 0x7b9   :  { %2346 = vsyncpa [#allocation3], 1 }
 0x7ba   :  { %2348 = vsyncpa [#allocation3 + $0x1], 1 }

</bundles_post_ra>
